<compile_context>
chip_gen: v6e
topology: v6e:2x2x1
jax: 0.10.0
libtpu: 0.0.40
codegen_flags: <defaults>
</compile_context>

<pallas_src>
import functools

import jax
import jax.numpy as jnp
from jax.experimental import pallas as pl
from jax.experimental.pallas import tpu as pltpu


# ----------------------------------------------------------------------------
# In-kernel helpers
# ----------------------------------------------------------------------------
def _layernorm(x, gamma, beta, eps=1e-5):
    mu = jnp.mean(x, axis=-1, keepdims=True)
    var = jnp.mean((x - mu) ** 2, axis=-1, keepdims=True)
    return (x - mu) * jax.lax.rsqrt(var + eps) * gamma + beta


# ----------------------------------------------------------------------------
# Single fused kernel: one batch element per grid step, all layers inside.
# ----------------------------------------------------------------------------
def _fused_kernel(x_ref, g_ref, be_ref, wqkv_ref, wo3_ref, bo_ref,
                  w1_ref, b1_ref, w2_ref, b2_ref, pu_ref,
                  o_ref,
                  qkv_s, hs_s,
                  *, depth, heads, scale):
    n, dim = x_ref.shape[1], x_ref.shape[2]
    dh3 = hs_s.shape[2]                 # 3 * dim_head
    dh = dh3 // 3
    m = n // heads                      # tokens per source-row block (sublane aligned)
    mlp = w1_ref.shape[1]

    # ---- loop-invariant loads & broadcasts, hoisted out of the depth loop ----
    g = jnp.broadcast_to(g_ref[...], (n, dim))
    be = jnp.broadcast_to(be_ref[...], (n, dim))
    bo = jnp.broadcast_to(bo_ref[...], (n, dim))
    b1 = jnp.broadcast_to(b1_ref[...], (n, mlp))
    b2 = jnp.broadcast_to(b2_ref[...], (n, dim))
    wqkv = wqkv_ref[...]                # (dim, 3*inner), chunk-interleaved columns
    wo3 = wo3_ref[...]                  # (heads, dh, dim)
    w1 = w1_ref[...]
    w2 = w2_ref[...]
    pu = pu_ref[...]                    # (n, n) constant un-permutation matrix

    def layer(_, x):
        # === attention sub-block: x = x + to_out(MHA(LN(x))) ===
        xn = _layernorm(x, g, be)
        # One wide MXU pass for Q, K, V (columns pre-interleaved per chunk).
        qkv_s[...] = jnp.dot(xn, wqkv, preferred_element_type=jnp.float32)

        # torch `.view(b, h, n, -1)` head split (row-major reinterpretation, NOT a
        # head transpose).  Chunk c of all rows goes to per-head rows in permuted
        # token order t~ = c*m + s; only `heads` contiguous block copies per layer.
        for c in range(heads):
            blk = qkv_s[:, c * dh3:(c + 1) * dh3]            # (n, 3*dh)
            hs_s[:, c * m:(c + 1) * m, :] = blk.reshape(heads, m, dh3)

        q3 = hs_s[:, :, 0:dh]                                # (heads, n, dh), permuted rows
        k3 = hs_s[:, :, dh:2 * dh]
        v3 = hs_s[:, :, 2 * dh:3 * dh]

        # Heads-batched attention (permutation of token order cancels out through
        # softmax + weighted sum; rows stay permuted until the Pu matmul below).
        dots = jax.lax.dot_general(q3, k3, (((2,), (2,)), ((0,), (0,))),
                                   preferred_element_type=jnp.float32) * scale
        mx = jnp.max(dots, axis=-1, keepdims=True)
        e = jnp.exp(dots - mx)
        p = e * pl.reciprocal(jnp.sum(e, axis=-1, keepdims=True), approx=True)
        attn_o = jax.lax.dot_general(p, v3, (((2,), (1,)), ((0,), (0,))),
                                     preferred_element_type=jnp.float32)   # (heads, n, dh)

        # 'b h n d -> b n (h d)' rearrange + to_out Linear, fused: per-head
        # projection (batched dot) + head-sum, then one constant matmul that
        # un-permutes the token rows.  Dropout == identity (eval).
        proj = jax.lax.dot_general(attn_o, wo3, (((2,), (1,)), ((0,), (0,))),
                                   preferred_element_type=jnp.float32)     # (heads, n, dim)
        z = jnp.sum(proj, axis=0)                                          # (n, dim), permuted
        y = jnp.dot(pu, z, preferred_element_type=jnp.float32)             # un-permute rows
        x = x + y + bo

        # === feed-forward sub-block: x = x + W2 tanh(W1 LN(x) + b1) + b2 ===
        xn2 = _layernorm(x, g, be)
        h1 = jnp.tanh(jnp.dot(xn2, w1, preferred_element_type=jnp.float32) + b1)
        x = x + jnp.dot(h1, w2, preferred_element_type=jnp.float32) + b2
        return x

    x0 = x_ref[0]                                            # (n, dim), resident all layers
    xf = jax.lax.fori_loop(0, depth, layer, x0)
    o_ref[0] = xf


# ----------------------------------------------------------------------------
# Parameter prep (done ONCE, outside the per-call path)
# ----------------------------------------------------------------------------
def prepare_params(p, *, heads, n):
    dim, inner = p["wq"].shape
    dh = inner // heads
    m = n // heads
    # Interleave q/k/v columns chunk-wise: per chunk c the kernel reads one
    # contiguous (n, 3*dh) slice [q_c | k_c | v_c].
    wq = p["wq"].reshape(dim, heads, dh)
    wk = p["wk"].reshape(dim, heads, dh)
    wv = p["wv"].reshape(dim, heads, dh)
    wqkv = jnp.stack([wq, wk, wv], axis=2).reshape(dim, 3 * inner)
    # Constant token un-permutation: y[t] = z[(t % heads) * m + t // heads].
    t = jnp.arange(n)
    perm = (t % heads) * m + (t // heads)
    pu = jax.nn.one_hot(perm, n, dtype=jnp.float32)
    return {
        "gamma": p["gamma"], "beta": p["beta"],
        "wqkv": wqkv,
        "wo3": p["wo"].reshape(heads, dh, dim),
        "bo": p["bo"],
        "w1": p["w1"], "b1": p["b1"], "w2": p["w2"], "b2": p["b2"],
        "pu": pu,
    }


# ----------------------------------------------------------------------------
# Forward wrapper: one pallas_call for the whole module.
# ----------------------------------------------------------------------------
def de_transformer_forward(x, prep, *, depth, heads):
    b, n, dim = x.shape
    inner = prep["wqkv"].shape[1] // 3
    dh = inner // heads
    mlp = prep["w1"].shape[1]
    m = n // heads
    assert n % heads == 0 and m % 8 == 0, (
        "kernel assumes heads | n and (n // heads) % 8 == 0 (sublane-aligned head split)")
    scale = dim ** -0.5                 # MultiAttention scales by dim, not dim_head

    kernel = functools.partial(_fused_kernel, depth=depth, heads=heads, scale=scale)

    return pl.pallas_call(
        kernel,
        out_shape=jax.ShapeDtypeStruct((b, n, dim), jnp.float32),
        grid=(b,),
        in_specs=[
            pl.BlockSpec((1, n, dim), lambda i: (i, 0, 0)),          # x
            pl.BlockSpec((1, dim), lambda i: (0, 0)),                # gamma
            pl.BlockSpec((1, dim), lambda i: (0, 0)),                # beta
            pl.BlockSpec((dim, 3 * inner), lambda i: (0, 0)),        # wqkv (interleaved)
            pl.BlockSpec((heads, dh, dim), lambda i: (0, 0, 0)),     # wo3
            pl.BlockSpec((1, dim), lambda i: (0, 0)),                # bo
            pl.BlockSpec((dim, mlp), lambda i: (0, 0)),              # w1
            pl.BlockSpec((1, mlp), lambda i: (0, 0)),                # b1
            pl.BlockSpec((mlp, dim), lambda i: (0, 0)),              # w2
            pl.BlockSpec((1, dim), lambda i: (0, 0)),                # b2
            pl.BlockSpec((n, n), lambda i: (0, 0)),                  # Pu (constant)
        ],
        out_specs=pl.BlockSpec((1, n, dim), lambda i: (i, 0, 0)),
        scratch_shapes=[
            pltpu.VMEM((n, 3 * inner), jnp.float32),                 # qkv projection
            pltpu.VMEM((heads, n, 3 * dh), jnp.float32),             # head-split q|k|v
        ],
        compiler_params=pltpu.CompilerParams(
            dimension_semantics=("parallel",),                       # >=2 steps -> v7x megacore
            vmem_limit_bytes=32 * 1024 * 1024),
    )(x, prep["gamma"], prep["beta"], prep["wqkv"], prep["wo3"], prep["bo"],
      prep["w1"], prep["b1"], prep["w2"], prep["b2"], prep["pu"])


# ----------------------------------------------------------------------------
# Pure-JAX reference (mirrors the PyTorch forward, eval-mode dropout)
# ----------------------------------------------------------------------------
def de_transformer_reference(x, p, *, depth, heads):
    b, n, dim = x.shape
    inner = p["wq"].shape[1]
    dh = inner // heads
    scale = dim ** -0.5

    def ln(y):
        mu = y.mean(-1, keepdims=True)
        var = ((y - mu) ** 2).mean(-1, keepdims=True)
        return (y - mu) / jnp.sqrt(var + 1e-5) * p["gamma"] + p["beta"]

    for _ in range(depth):
        res = x
        xn = ln(x)
        q = (xn @ p["wq"]).reshape(b, heads, n, dh)     # torch .view semantics
        k = (xn @ p["wk"]).reshape(b, heads, n, dh)
        v = (xn @ p["wv"]).reshape(b, heads, n, dh)
        dots = jnp.einsum("bhid,bhjd->bhij", q, k) * scale
        attn = jax.nn.softmax(dots, axis=-1)
        o = jnp.einsum("bhij,bhjd->bhid", attn, v)
        o = jnp.transpose(o, (0, 2, 1, 3)).reshape(b, n, inner)
        x = res + (o @ p["wo"] + p["bo"])
        res = x
        xn = ln(x)
        x = (jnp.tanh(xn @ p["w1"] + p["b1"]) @ p["w2"] + p["b2"]) + res
    return x


# ----------------------------------------------------------------------------
if __name__ == "__main__":
    # NOTE: same shared weights / single LayerNorm reused across depth (as in the
    # PyTorch module), and scale = dim**-0.5 (MultiAttention uses dim, not dim_head).
    dim, depth, heads, dim_head, mlp_dim = 32, 2, 4, 8, 64
    b, n = 2, 32                        # n // heads = 8 -> sublane-aligned head split
    inner = heads * dim_head

    key = jax.random.PRNGKey(0)
    ks = jax.random.split(key, 8)
    params = {
        # Linear weights stored pre-transposed as (in, out): y = x @ W
        "wq": jax.random.normal(ks[0], (dim, inner), jnp.float32) * 0.05,
        "wk": jax.random.normal(ks[1], (dim, inner), jnp.float32) * 0.05,
        "wv": jax.random.normal(ks[2], (dim, inner), jnp.float32) * 0.05,
        "wo": jax.random.normal(ks[3], (inner, dim), jnp.float32) * 0.05,
        "bo": jax.random.normal(ks[4], (1, dim), jnp.float32) * 0.01,
        "gamma": jnp.ones((1, dim), jnp.float32),
        "beta": jnp.zeros((1, dim), jnp.float32),
        "w1": jax.random.normal(ks[5], (dim, mlp_dim), jnp.float32) * 0.05,
        "b1": jax.random.normal(ks[6], (1, mlp_dim), jnp.float32) * 0.01,
        "w2": jax.random.normal(ks[7], (mlp_dim, dim), jnp.float32) * 0.05,
        "b2": jnp.zeros((1, dim), jnp.float32),
    }

    x = jax.random.normal(jax.random.PRNGKey(42), (b, n, dim), jnp.float32)

    prep = prepare_params(params, heads=heads, n=n)          # once, outside per-call path
    fwd = jax.jit(functools.partial(de_transformer_forward, depth=depth, heads=heads))
    out = jax.block_until_ready(fwd(x, prep))

    ref_out = de_transformer_reference(x, params, depth=depth, heads=heads)

    assert out.shape == (b, n, dim)
    # tolerance slightly loosened for the approximate (EUP) softmax reciprocal
    assert jnp.allclose(out, ref_out, atol=2e-3, rtol=2e-3)

    print("KERNEL_OK")
</pallas_src>

<mosaic_0001>
module attributes {stable_mosaic.version = 11 : i64} {
  func.func @_fused_kernel(%arg0: i32, %arg1: memref<1x32x32xf32, #tpu.memory_space<vmem>>, %arg2: memref<1x32xf32, #tpu.memory_space<vmem>>, %arg3: memref<1x32xf32, #tpu.memory_space<vmem>>, %arg4: memref<32x96xf32, #tpu.memory_space<vmem>>, %arg5: memref<4x8x32xf32, #tpu.memory_space<vmem>>, %arg6: memref<1x32xf32, #tpu.memory_space<vmem>>, %arg7: memref<32x64xf32, #tpu.memory_space<vmem>>, %arg8: memref<1x64xf32, #tpu.memory_space<vmem>>, %arg9: memref<64x32xf32, #tpu.memory_space<vmem>>, %arg10: memref<1x32xf32, #tpu.memory_space<vmem>>, %arg11: memref<32x32xf32, #tpu.memory_space<vmem>>, %arg12: memref<1x32x32xf32, #tpu.memory_space<vmem>>, %arg13: memref<32x96xf32, #tpu.memory_space<vmem>>, %arg14: memref<4x32x24xf32, #tpu.memory_space<vmem>>) attributes {dimension_semantics = [#tpu.dimension_semantics<parallel>], iteration_bounds = array<i64: 2>, scalar_prefetch = 0 : i64, scratch_operands = 2 : i64, tpu.core_type = #tpu.core_type<tc>, window_params = [{transform_indices = @transform_0, window_bounds = array<i64: 1, 32, 32>}, {pipeline_mode = #tpu.pipeline_mode<synchronous>, transform_indices = @transform_1, window_bounds = array<i64: 1, 32>}, {pipeline_mode = #tpu.pipeline_mode<synchronous>, transform_indices = @transform_2, window_bounds = array<i64: 1, 32>}, {pipeline_mode = #tpu.pipeline_mode<synchronous>, transform_indices = @transform_3, window_bounds = array<i64: 32, 96>}, {pipeline_mode = #tpu.pipeline_mode<synchronous>, transform_indices = @transform_4, window_bounds = array<i64: 4, 8, 32>}, {pipeline_mode = #tpu.pipeline_mode<synchronous>, transform_indices = @transform_5, window_bounds = array<i64: 1, 32>}, {pipeline_mode = #tpu.pipeline_mode<synchronous>, transform_indices = @transform_6, window_bounds = array<i64: 32, 64>}, {pipeline_mode = #tpu.pipeline_mode<synchronous>, transform_indices = @transform_7, window_bounds = array<i64: 1, 64>}, {pipeline_mode = #tpu.pipeline_mode<synchronous>, transform_indices = @transform_8, window_bounds = array<i64: 64, 32>}, {pipeline_mode = #tpu.pipeline_mode<synchronous>, transform_indices = @transform_9, window_bounds = array<i64: 1, 32>}, {pipeline_mode = #tpu.pipeline_mode<synchronous>, transform_indices = @transform_10, window_bounds = array<i64: 32, 32>}, {transform_indices = @transform_11, window_bounds = array<i64: 1, 32, 32>}]} {
    %c0 = arith.constant 0 : index
    %c0_0 = arith.constant 0 : index
    %0 = vector.load %arg2[%c0, %c0_0] : memref<1x32xf32, #tpu.memory_space<vmem>>, vector<1x32xf32>
    %1 = vector.shape_cast %0 : vector<1x32xf32> to vector<1x32xf32>
    %2 = vector.broadcast %1 : vector<1x32xf32> to vector<32x32xf32>
    %c0_1 = arith.constant 0 : index
    %c0_2 = arith.constant 0 : index
    %3 = vector.load %arg3[%c0_1, %c0_2] : memref<1x32xf32, #tpu.memory_space<vmem>>, vector<1x32xf32>
    %4 = vector.shape_cast %3 : vector<1x32xf32> to vector<1x32xf32>
    %5 = vector.broadcast %4 : vector<1x32xf32> to vector<32x32xf32>
    %c0_3 = arith.constant 0 : index
    %c0_4 = arith.constant 0 : index
    %6 = vector.load %arg6[%c0_3, %c0_4] : memref<1x32xf32, #tpu.memory_space<vmem>>, vector<1x32xf32>
    %7 = vector.shape_cast %6 : vector<1x32xf32> to vector<1x32xf32>
    %8 = vector.broadcast %7 : vector<1x32xf32> to vector<32x32xf32>
    %c0_5 = arith.constant 0 : index
    %c0_6 = arith.constant 0 : index
    %9 = vector.load %arg8[%c0_5, %c0_6] : memref<1x64xf32, #tpu.memory_space<vmem>>, vector<1x64xf32>
    %10 = vector.shape_cast %9 : vector<1x64xf32> to vector<1x64xf32>
    %11 = vector.broadcast %10 : vector<1x64xf32> to vector<32x64xf32>
    %c0_7 = arith.constant 0 : index
    %c0_8 = arith.constant 0 : index
    %12 = vector.load %arg10[%c0_7, %c0_8] : memref<1x32xf32, #tpu.memory_space<vmem>>, vector<1x32xf32>
    %13 = vector.shape_cast %12 : vector<1x32xf32> to vector<1x32xf32>
    %14 = vector.broadcast %13 : vector<1x32xf32> to vector<32x32xf32>
    %c0_9 = arith.constant 0 : index
    %c0_10 = arith.constant 0 : index
    %15 = vector.load %arg4[%c0_9, %c0_10] : memref<32x96xf32, #tpu.memory_space<vmem>>, vector<32x96xf32>
    %c0_11 = arith.constant 0 : index
    %c0_12 = arith.constant 0 : index
    %c0_13 = arith.constant 0 : index
    %16 = vector.load %arg5[%c0_11, %c0_12, %c0_13] : memref<4x8x32xf32, #tpu.memory_space<vmem>>, vector<4x8x32xf32>
    %c0_14 = arith.constant 0 : index
    %c0_15 = arith.constant 0 : index
    %17 = vector.load %arg7[%c0_14, %c0_15] : memref<32x64xf32, #tpu.memory_space<vmem>>, vector<32x64xf32>
    %c0_16 = arith.constant 0 : index
    %c0_17 = arith.constant 0 : index
    %18 = vector.load %arg9[%c0_16, %c0_17] : memref<64x32xf32, #tpu.memory_space<vmem>>, vector<64x32xf32>
    %c0_18 = arith.constant 0 : index
    %c0_19 = arith.constant 0 : index
    %19 = vector.load %arg11[%c0_18, %c0_19] : memref<32x32xf32, #tpu.memory_space<vmem>>, vector<32x32xf32>
    %c0_20 = arith.constant 0 : index
    %c0_21 = arith.constant 0 : index
    %c0_22 = arith.constant 0 : index
    %20 = vector.load %arg1[%c0_20, %c0_21, %c0_22] : memref<1x32x32xf32, #tpu.memory_space<vmem>>, vector<1x32x32xf32>
    %21 = vector.shape_cast %20 : vector<1x32x32xf32> to vector<32x32xf32>
    %c0_i32 = arith.constant 0 : i32
    %c2_i32 = arith.constant 2 : i32
    %22 = arith.addi %c0_i32, %c2_i32 : i32
    %c1_i32 = arith.constant 1 : i32
    %23 = scf.for %arg15 = %c0_i32 to %22 step %c1_i32 iter_args(%arg16 = %21) -> (vector<32x32xf32>)  : i32 {
      %cst = arith.constant dense<0.000000e+00> : vector<32xf32>
      %27 = vector.multi_reduction <add>, %arg16, %cst [1] : vector<32x32xf32> to vector<32xf32>
      %28 = vector.shape_cast %27 : vector<32xf32> to vector<32x1xf32>
      %cst_26 = arith.constant 3.200000e+01 : f32
      %29 = vector.broadcast %cst_26 : f32 to vector<32x1xf32>
      %30 = arith.divf %28, %29 : vector<32x1xf32>
      %31 = vector.broadcast %30 : vector<32x1xf32> to vector<32x32xf32>
      %32 = arith.subf %arg16, %31 : vector<32x32xf32>
      %33 = arith.mulf %32, %32 : vector<32x32xf32>
      %cst_27 = arith.constant dense<0.000000e+00> : vector<32xf32>
      %34 = vector.multi_reduction <add>, %33, %cst_27 [1] : vector<32x32xf32> to vector<32xf32>
      %35 = vector.shape_cast %34 : vector<32xf32> to vector<32x1xf32>
      %cst_28 = arith.constant 3.200000e+01 : f32
      %36 = vector.broadcast %cst_28 : f32 to vector<32x1xf32>
      %37 = arith.divf %35, %36 : vector<32x1xf32>
      %38 = vector.broadcast %30 : vector<32x1xf32> to vector<32x32xf32>
      %39 = arith.subf %arg16, %38 : vector<32x32xf32>
      %cst_29 = arith.constant 9.99999974E-6 : f32
      %40 = vector.broadcast %cst_29 : f32 to vector<32x1xf32>
      %41 = arith.addf %37, %40 : vector<32x1xf32>
      %42 = math.rsqrt %41 : vector<32x1xf32>
      %43 = vector.broadcast %42 : vector<32x1xf32> to vector<32x32xf32>
      %44 = arith.mulf %39, %43 : vector<32x32xf32>
      %45 = arith.mulf %44, %2 : vector<32x32xf32>
      %46 = arith.addf %45, %5 : vector<32x32xf32>
      %cst_30 = arith.constant dense<0.000000e+00> : vector<32x96xf32>
      %47 = tpu.matmul %46, %15, %cst_30 {dimension_numbers = #tpu.dot_dimension_numbers<[1], [0], [0], [1], [0, 0, 1, 1], [], []>} : vector<32x32xf32>, vector<32x96xf32>, vector<32x96xf32> -> vector<32x96xf32>
      %c0_31 = arith.constant 0 : index
      %c0_32 = arith.constant 0 : index
      %48 = vector.load %arg13[%c0_31, %c0_32] : memref<32x96xf32, #tpu.memory_space<vmem>>, vector<32x96xf32>
      tpu.vector_store %arg13[%c0_31, %c0_32], %47 {strides = array<i32>} : memref<32x96xf32, #tpu.memory_space<vmem>>, vector<32x96xf32>,
      %c0_33 = arith.constant 0 : index
      %c0_34 = arith.constant 0 : index
      %49 = vector.load %arg13[%c0_33, %c0_34] : memref<32x96xf32, #tpu.memory_space<vmem>>, vector<32x24xf32>
      %50 = vector.shape_cast %49 : vector<32x24xf32> to vector<4x8x24xf32>
      %c0_35 = arith.constant 0 : index
      %c0_36 = arith.constant 0 : index
      %c0_37 = arith.constant 0 : index
      %51 = vector.load %arg14[%c0_35, %c0_36, %c0_37] : memref<4x32x24xf32, #tpu.memory_space<vmem>>, vector<4x8x24xf32>
      tpu.vector_store %arg14[%c0_35, %c0_36, %c0_37], %50 {strides = array<i32>} : memref<4x32x24xf32, #tpu.memory_space<vmem>>, vector<4x8x24xf32>,
      %c0_38 = arith.constant 0 : index
      %c24 = arith.constant 24 : index
      %52 = vector.load %arg13[%c0_38, %c24] : memref<32x96xf32, #tpu.memory_space<vmem>>, vector<32x24xf32>
      %53 = vector.shape_cast %52 : vector<32x24xf32> to vector<4x8x24xf32>
      %c0_39 = arith.constant 0 : index
      %c8 = arith.constant 8 : index
      %c0_40 = arith.constant 0 : index
      %54 = vector.load %arg14[%c0_39, %c8, %c0_40] : memref<4x32x24xf32, #tpu.memory_space<vmem>>, vector<4x8x24xf32>
      tpu.vector_store %arg14[%c0_39, %c8, %c0_40], %53 {strides = array<i32>} : memref<4x32x24xf32, #tpu.memory_space<vmem>>, vector<4x8x24xf32>,
      %c0_41 = arith.constant 0 : index
      %c48 = arith.constant 48 : index
      %55 = vector.load %arg13[%c0_41, %c48] : memref<32x96xf32, #tpu.memory_space<vmem>>, vector<32x24xf32>
      %56 = vector.shape_cast %55 : vector<32x24xf32> to vector<4x8x24xf32>
      %c0_42 = arith.constant 0 : index
      %c16 = arith.constant 16 : index
      %c0_43 = arith.constant 0 : index
      %57 = vector.load %arg14[%c0_42, %c16, %c0_43] : memref<4x32x24xf32, #tpu.memory_space<vmem>>, vector<4x8x24xf32>
      tpu.vector_store %arg14[%c0_42, %c16, %c0_43], %56 {strides = array<i32>} : memref<4x32x24xf32, #tpu.memory_space<vmem>>, vector<4x8x24xf32>,
      %c0_44 = arith.constant 0 : index
      %c72 = arith.constant 72 : index
      %58 = vector.load %arg13[%c0_44, %c72] : memref<32x96xf32, #tpu.memory_space<vmem>>, vector<32x24xf32>
      %59 = vector.shape_cast %58 : vector<32x24xf32> to vector<4x8x24xf32>
      %c0_45 = arith.constant 0 : index
      %c24_46 = arith.constant 24 : index
      %c0_47 = arith.constant 0 : index
      %60 = vector.load %arg14[%c0_45, %c24_46, %c0_47] : memref<4x32x24xf32, #tpu.memory_space<vmem>>, vector<4x8x24xf32>
      tpu.vector_store %arg14[%c0_45, %c24_46, %c0_47], %59 {strides = array<i32>} : memref<4x32x24xf32, #tpu.memory_space<vmem>>, vector<4x8x24xf32>,
      %c0_48 = arith.constant 0 : index
      %c0_49 = arith.constant 0 : index
      %c0_50 = arith.constant 0 : index
      %61 = vector.load %arg14[%c0_48, %c0_49, %c0_50] : memref<4x32x24xf32, #tpu.memory_space<vmem>>, vector<4x32x8xf32>
      %c0_51 = arith.constant 0 : index
      %c0_52 = arith.constant 0 : index
      %c8_53 = arith.constant 8 : index
      %62 = vector.load %arg14[%c0_51, %c0_52, %c8_53] : memref<4x32x24xf32, #tpu.memory_space<vmem>>, vector<4x32x8xf32>
      %c0_54 = arith.constant 0 : index
      %c0_55 = arith.constant 0 : index
      %c16_56 = arith.constant 16 : index
      %63 = vector.load %arg14[%c0_54, %c0_55, %c16_56] : memref<4x32x24xf32, #tpu.memory_space<vmem>>, vector<4x32x8xf32>
      %cst_57 = arith.constant dense<0.000000e+00> : vector<4x32x32xf32>
      %64 = tpu.matmul %61, %62, %cst_57 {dimension_numbers = #tpu.dot_dimension_numbers<[2], [2], [1], [1], [0, 0, 0, 1, 1, 1], [0], [0]>} : vector<4x32x8xf32>, vector<4x32x8xf32>, vector<4x32x32xf32> -> vector<4x32x32xf32>
      %cst_58 = arith.constant 0.176776692 : f32
      %65 = vector.broadcast %cst_58 : f32 to vector<4x32x32xf32>
      %66 = arith.mulf %64, %65 : vector<4x32x32xf32>
      %cst_59 = arith.constant dense<0xFF800000> : vector<4x32xf32>
      %67 = vector.multi_reduction <maximumf>, %66, %cst_59 [2] : vector<4x32x32xf32> to vector<4x32xf32>
      %68 = vector.shape_cast %67 : vector<4x32xf32> to vector<4x32x1xf32>
      %69 = vector.broadcast %68 : vector<4x32x1xf32> to vector<4x32x32xf32>
      %70 = arith.subf %66, %69 : vector<4x32x32xf32>
      %71 = math.exp %70 : vector<4x32x32xf32>
      %cst_60 = arith.constant dense<0.000000e+00> : vector<4x32xf32>
      %72 = vector.multi_reduction <add>, %71, %cst_60 [2] : vector<4x32x32xf32> to vector<4x32xf32>
      %73 = vector.shape_cast %72 : vector<4x32xf32> to vector<4x32x1xf32>
      %74 = tpu.reciprocal %73 {approx = true} : vector<4x32x1xf32> -> vector<4x32x1xf32>
      %75 = vector.broadcast %74 : vector<4x32x1xf32> to vector<4x32x32xf32>
      %76 = arith.mulf %71, %75 : vector<4x32x32xf32>
      %cst_61 = arith.constant dense<0.000000e+00> : vector<4x32x8xf32>
      %77 = tpu.matmul %76, %63, %cst_61 {dimension_numbers = #tpu.dot_dimension_numbers<[2], [1], [1], [2], [0, 0, 0, 1, 1, 2], [0], [0]>} : vector<4x32x32xf32>, vector<4x32x8xf32>, vector<4x32x8xf32> -> vector<4x32x8xf32>
      %cst_62 = arith.constant dense<0.000000e+00> : vector<4x32x32xf32>
      %78 = tpu.matmul %77, %16, %cst_62 {dimension_numbers = #tpu.dot_dimension_numbers<[2], [1], [1], [2], [0, 0, 0, 1, 1, 2], [0], [0]>} : vector<4x32x8xf32>, vector<4x8x32xf32>, vector<4x32x32xf32> -> vector<4x32x32xf32>
      %cst_63 = arith.constant dense<0.000000e+00> : vector<32x32xf32>
      %79 = vector.multi_reduction <add>, %78, %cst_63 [0] : vector<4x32x32xf32> to vector<32x32xf32>
      %cst_64 = arith.constant dense<0.000000e+00> : vector<32x32xf32>
      %80 = tpu.matmul %19, %79, %cst_64 {dimension_numbers = #tpu.dot_dimension_numbers<[1], [0], [0], [1], [0, 0, 1, 1], [], []>} : vector<32x32xf32>, vector<32x32xf32>, vector<32x32xf32> -> vector<32x32xf32>
      %81 = arith.addf %arg16, %80 : vector<32x32xf32>
      %82 = arith.addf %81, %8 : vector<32x32xf32>
      %cst_65 = arith.constant dense<0.000000e+00> : vector<32xf32>
      %83 = vector.multi_reduction <add>, %82, %cst_65 [1] : vector<32x32xf32> to vector<32xf32>
      %84 = vector.shape_cast %83 : vector<32xf32> to vector<32x1xf32>
      %cst_66 = arith.constant 3.200000e+01 : f32
      %85 = vector.broadcast %cst_66 : f32 to vector<32x1xf32>
      %86 = arith.divf %84, %85 : vector<32x1xf32>
      %87 = vector.broadcast %86 : vector<32x1xf32> to vector<32x32xf32>
      %88 = arith.subf %82, %87 : vector<32x32xf32>
      %89 = arith.mulf %88, %88 : vector<32x32xf32>
      %cst_67 = arith.constant dense<0.000000e+00> : vector<32xf32>
      %90 = vector.multi_reduction <add>, %89, %cst_67 [1] : vector<32x32xf32> to vector<32xf32>
      %91 = vector.shape_cast %90 : vector<32xf32> to vector<32x1xf32>
      %cst_68 = arith.constant 3.200000e+01 : f32
      %92 = vector.broadcast %cst_68 : f32 to vector<32x1xf32>
      %93 = arith.divf %91, %92 : vector<32x1xf32>
      %94 = vector.broadcast %86 : vector<32x1xf32> to vector<32x32xf32>
      %95 = arith.subf %82, %94 : vector<32x32xf32>
      %cst_69 = arith.constant 9.99999974E-6 : f32
      %96 = vector.broadcast %cst_69 : f32 to vector<32x1xf32>
      %97 = arith.addf %93, %96 : vector<32x1xf32>
      %98 = math.rsqrt %97 : vector<32x1xf32>
      %99 = vector.broadcast %98 : vector<32x1xf32> to vector<32x32xf32>
      %100 = arith.mulf %95, %99 : vector<32x32xf32>
      %101 = arith.mulf %100, %2 : vector<32x32xf32>
      %102 = arith.addf %101, %5 : vector<32x32xf32>
      %cst_70 = arith.constant dense<0.000000e+00> : vector<32x64xf32>
      %103 = tpu.matmul %102, %17, %cst_70 {dimension_numbers = #tpu.dot_dimension_numbers<[1], [0], [0], [1], [0, 0, 1, 1], [], []>} : vector<32x32xf32>, vector<32x64xf32>, vector<32x64xf32> -> vector<32x64xf32>
      %104 = arith.addf %103, %11 : vector<32x64xf32>
      %105 = math.tanh %104 : vector<32x64xf32>
      %cst_71 = arith.constant dense<0.000000e+00> : vector<32x32xf32>
      %106 = tpu.matmul %105, %18, %cst_71 {dimension_numbers = #tpu.dot_dimension_numbers<[1], [0], [0], [1], [0, 0, 1, 1], [], []>} : vector<32x64xf32>, vector<64x32xf32>, vector<32x32xf32> -> vector<32x32xf32>
      %107 = arith.addf %82, %106 : vector<32x32xf32>
      %108 = arith.addf %107, %14 : vector<32x32xf32>
      scf.yield %108 : vector<32x32xf32>
    }
    %c0_23 = arith.constant 0 : index
    %c0_24 = arith.constant 0 : index
    %c0_25 = arith.constant 0 : index
    %24 = vector.load %arg12[%c0_23, %c0_24, %c0_25] : memref<1x32x32xf32, #tpu.memory_space<vmem>>, vector<1x32x32xf32>
    %25 = vector.shape_cast %24 : vector<1x32x32xf32> to vector<32x32xf32>
    %26 = vector.shape_cast %23 : vector<32x32xf32> to vector<1x32x32xf32>
    tpu.vector_store %arg12[%c0_23, %c0_24, %c0_25], %26 {strides = array<i32>} : memref<1x32x32xf32, #tpu.memory_space<vmem>>, vector<1x32x32xf32>,
    return
  }
  func.func @transform_0(%arg0: i32) -> (i32, i32, i32) {
    %c0_i32 = arith.constant 0 : i32
    %c0_i32_0 = arith.constant 0 : i32
    %c0_i32_1 = arith.constant 0 : i32
    return %arg0, %c0_i32, %c0_i32_0 : i32, i32, i32
  }
  func.func @transform_1(%arg0: i32) -> (i32, i32) {
    %c0_i32 = arith.constant 0 : i32
    %c0_i32_0 = arith.constant 0 : i32
    %c0_i32_1 = arith.constant 0 : i32
    return %c0_i32, %c0_i32_0 : i32, i32
  }
  func.func @transform_2(%arg0: i32) -> (i32, i32) {
    %c0_i32 = arith.constant 0 : i32
    %c0_i32_0 = arith.constant 0 : i32
    %c0_i32_1 = arith.constant 0 : i32
    return %c0_i32, %c0_i32_0 : i32, i32
  }
  func.func @transform_3(%arg0: i32) -> (i32, i32) {
    %c0_i32 = arith.constant 0 : i32
    %c0_i32_0 = arith.constant 0 : i32
    %c0_i32_1 = arith.constant 0 : i32
    return %c0_i32, %c0_i32_0 : i32, i32
  }
  func.func @transform_4(%arg0: i32) -> (i32, i32, i32) {
    %c0_i32 = arith.constant 0 : i32
    %c0_i32_0 = arith.constant 0 : i32
    %c0_i32_1 = arith.constant 0 : i32
    %c0_i32_2 = arith.constant 0 : i32
    return %c0_i32, %c0_i32_0, %c0_i32_1 : i32, i32, i32
  }
  func.func @transform_5(%arg0: i32) -> (i32, i32) {
    %c0_i32 = arith.constant 0 : i32
    %c0_i32_0 = arith.constant 0 : i32
    %c0_i32_1 = arith.constant 0 : i32
    return %c0_i32, %c0_i32_0 : i32, i32
  }
  func.func @transform_6(%arg0: i32) -> (i32, i32) {
    %c0_i32 = arith.constant 0 : i32
    %c0_i32_0 = arith.constant 0 : i32
    %c0_i32_1 = arith.constant 0 : i32
    return %c0_i32, %c0_i32_0 : i32, i32
  }
  func.func @transform_7(%arg0: i32) -> (i32, i32) {
    %c0_i32 = arith.constant 0 : i32
    %c0_i32_0 = arith.constant 0 : i32
    %c0_i32_1 = arith.constant 0 : i32
    return %c0_i32, %c0_i32_0 : i32, i32
  }
  func.func @transform_8(%arg0: i32) -> (i32, i32) {
    %c0_i32 = arith.constant 0 : i32
    %c0_i32_0 = arith.constant 0 : i32
    %c0_i32_1 = arith.constant 0 : i32
    return %c0_i32, %c0_i32_0 : i32, i32
  }
  func.func @transform_9(%arg0: i32) -> (i32, i32) {
    %c0_i32 = arith.constant 0 : i32
    %c0_i32_0 = arith.constant 0 : i32
    %c0_i32_1 = arith.constant 0 : i32
    return %c0_i32, %c0_i32_0 : i32, i32
  }
  func.func @transform_10(%arg0: i32) -> (i32, i32) {
    %c0_i32 = arith.constant 0 : i32
    %c0_i32_0 = arith.constant 0 : i32
    %c0_i32_1 = arith.constant 0 : i32
    return %c0_i32, %c0_i32_0 : i32, i32
  }
  func.func @transform_11(%arg0: i32) -> (i32, i32, i32) {
    %c0_i32 = arith.constant 0 : i32
    %c0_i32_0 = arith.constant 0 : i32
    %c0_i32_1 = arith.constant 0 : i32
    return %arg0, %c0_i32, %c0_i32_0 : i32, i32, i32
  }
}

</mosaic_0001>

<bundles_post_ra>
// kernel: de_transformer_forward.1
= control target key start
LH: loop header
LB: loop body
LE: loop exit
PB: predicated region body
PF: predicated region fallthrough
CT: control target
= control target key end

     0   :  { %16 = vsyncpa [#allocation5], 0  ;;  %s4664_s0 = inlined_call_operand.vmem [shape: f32[2,32,32], index: 0, kind: input, shape index: {}]   ;;  %s4665_s1 = inlined_call_operand.vmem [shape: f32[1,32], index: 1, kind: input, shape index: {}]   ;;  %s4666_s2 = inlined_call_operand.vmem [shape: f32[1,32], index: 2, kind: input, shape index: {}]   ;;  %s4667_s3 = inlined_call_operand.vmem [shape: f32[32,96], index: 3, kind: input, shape index: {}]   ;;  %s4668_s4 = inlined_call_operand.hbm [shape: f32[4,8,32], index: 4, kind: input, shape index: {}]   ;;  %s4669_s5 = inlined_call_operand.vmem [shape: f32[1,32], index: 5, kind: input, shape index: {}]   ;;  %s4670_s6 = inlined_call_operand.hbm [shape: f32[32,64], index: 6, kind: input, shape index: {}]   ;;  %s4671_s7 = inlined_call_operand.hbm [shape: f32[1,64], index: 7, kind: input, shape index: {}]   ;;  %s4672_s8 = inlined_call_operand.vmem [shape: f32[64,32], index: 8, kind: input, shape index: {}]   ;;  %s4673_s9 = inlined_call_operand.hbm [shape: f32[1,32], index: 9, kind: input, shape index: {}]   ;;  %s4674_s10 = inlined_call_operand.hbm [shape: f32[32,32], index: 10, kind: input, shape index: {}]   ;;  %s4675_s11 = inlined_call_operand.hbm [shape: f32[2,32,32], index: 11, kind: output, shape index: {}]  }
   0x1   :  { %17 = vsyncpa [#allocation8], 0 }
   0x2   :  { %18 = vsyncpa [#allocation11], 0 }
   0x3   :  { %19 = vsyncpa [#allocation6], 0 }
   0x4   :  { %21 = vsyncpa [#allocation6 + $0x1], 0  ;;  %s3790_s17 = smov 0   ;;  %s3792_s18 = smov 0  }
   0x5   :  { %s3794_s19 = smov 0   ;;  %s3796_s20 = smov 0  }
   0x6 LB: > { %4688 = sst [smem:[#allocation18_spill]] %s3689_s19  ;;  %s3811_s21 = sadd.s32 4294967295, %s3693_s20   ;;  %s3693_s20 = sphi %s3796_s20, %s4721_s20   ;;  %s3689_s19 = sphi %s3794_s19, %s4723_s19   ;;  %s3685_s18 = sphi %s3792_s18, %s4725_s18   ;;  %s3681_s17 = sphi %s3790_s17, %s4724_s17  }
   0x7   : > { %s2805_s22 = sadd.s32 4294967294, %s3693_s20   ;;  %s3815_s23 = sadd.s32 1, %s3693_s20  }
   0x8   : > { %4689 = sst [smem:[#allocation19_spill]] %s3815_s23  ;;  %s270_s24 = sadd.s32 1, %s3689_s19 }
   0x9   : > { %s267_s25 = ssub.s32 %s3693_s20, %s3815_s23  ;;  %p280_p0 = scmp.ne.s32.totalorder %s3689_s19, %s3685_s18 }
   0xa   : > { %p268_p1 = scmp.eq.s32.totalorder %s267_s25, 0  ;;  %p281_p2 = scmp.eq.s32.totalorder %s3811_s21, 1 }
   0xb   : > { %p286_p3 = scmp.ne.s32.totalorder %s3685_s18, %s3681_s17  ;;  %p287_p4 = scmp.eq.s32.totalorder %s2805_s22, 1 }
   0xc   : > { %s3826_s26 = scalar_select %p268_p1, %s3689_s19, %s270_s24  }
   0xd   : > { %p3828_p5 = por %p281_p2, %p280_p0  ;;  %p3832_p6 = por %p287_p4, %p286_p3 }
   0xe   : > { %4690 = sst [smem:[#allocation20_spill]] %s3826_s26  ;;  %p2806_p7 = scmp.ge.s32.totalorder %s3693_s20, 1 }
   0xf   : > { %s4691_s27 = scalar_select %p3828_p5, 1, 0 }
  0x10   : > { %s4692_s28 = scalar_select %p3832_p6, 1, 0 }
  0x11   : > { %p294_p8 = scmp.lt.s32.totalorder %s3693_s20, 3  ;;  %p4680_p9 = scmp.eq.s32.totalorder %s3811_s21, 0 }
  0x12   : > { %4693 = sst [smem:[#allocation21_spill]] %s4692_s28  ;;  %s3715_s30 = smov [#allocation7]  }
  0x13   : > { %p3839_p10 = pnand %p2806_p7, %p294_p8  ;;  %s331_s12 = sshll.u32 %s3715_s30, 4  ;;  %s332_s12 = int_to_ptr.vmem [resolvable:$true] %s331_s12 }
  0x14   : > { %s3716_s14 = smov [#allocation10]   ;;  %s3717_s16 = smov [#allocation4]  }
  0x15   : > { %s4694_s29 = scalar_select %p3839_p10, 1, 0 }
  0x16   : > { %p3266_p11 = pneg %p3839_p10  ;;  %s359_s15 = sshll.u32 %s3716_s14, 4  ;;  %s360_s15 = int_to_ptr.vmem [resolvable:$true] %s359_s15 }
  0x17   : > { %s315_s22 = sshll.u32 %s3717_s16, 4  ;;  %s3482_s25 = scalar_lea.vmem %s332_s12, 512  ;;  %s316_s22 = int_to_ptr.vmem [resolvable:$true] %s315_s22 }
  0x18   : > { %p3847_p12 = pnand %p4680_p9, %p3266_p11  ;;  %p3483_p0 = scmp.ne.s32.totalorder %s332_s12, %s3482_s25 }
  0x19   : > { %p3490_p3 = scmp.lt.s32.totalorder %s332_s12, %s332_s12  ;;  %p3491_p4 = scmp.lt.s32.totalorder %s3482_s25, %s3482_s25 }
  0x1a   : > { %p3853_p13 = pneg %p3847_p12 }
  0x1b   : > { %p3492_p7 = por %p3491_p4, %p3490_p3 }
  0x1c   : > { %p3485_p1 = pnand %p3483_p0, %p3853_p13 }
  0x1e   : > { %p3486_p2 = pneg %p3485_p1 }
  0x20   : > { %p3493_p8 = pnand %p3492_p7, %p3486_p2 }
  0x22   : > { %3496 = shalt.err (!%p3493_p8)
}
  0x23   : > { %s3718_s30 = smov 128   ;;  %s3719_s14 = smov 8  }
  0x24   : > { %3272 = dma.hbm_to_vmem [thread:$0]  (!%p3847_p12), %s4670_s6, 512, %s332_s12, [#allocation8], %s3718_s30, %s3718_s30, %s3719_s14  }
  0x25   : > { %s3508_s19 = scalar_lea.vmem %s360_s15, 16  ;;  %s3515_s25 = scalar_lea.vmem %s360_s15, 32 }
  0x26   : > { %p3509_p11 = scmp.ne.s32.totalorder %s360_s15, %s3508_s19  ;;  %p3516_p2 = scmp.lt.s32.totalorder %s360_s15, %s360_s15 }
  0x27   : > { %p3517_p3 = scmp.lt.s32.totalorder %s3515_s25, %s3508_s19 }
  0x28   : > { %p3511_p0 = pnand %p3509_p11, %p3853_p13 }
  0x29   : > { %p3518_p4 = por %p3517_p3, %p3516_p2 }
  0x2a   : > { %p3512_p1 = pneg %p3511_p0 }
  0x2c   : > { %p3519_p7 = pnand %p3518_p4, %p3512_p1 }
  0x2e   : > { %3522 = shalt.err (!%p3519_p7)
}
  0x2f   : > { %3278 = dma.hbm_to_vmem [thread:$0]  (!%p3847_p12), %s4673_s9, 16, %s360_s15, [#allocation11]  }
  0x30   : > { %s3534_s26 = scalar_lea.vmem %s316_s22, 512  ;;  %p3542_p0 = scmp.lt.s32.totalorder %s316_s22, %s316_s22 }
  0x31   : > { %p3535_p8 = scmp.ne.s32.totalorder %s316_s22, %s3534_s26  ;;  %p3543_p6 = scmp.lt.s32.totalorder %s3534_s26, %s3534_s26 }
  0x33   : > { %p3537_p9 = pnand %p3535_p8, %p3853_p13  ;;  %p3544_p5 = por %p3543_p6, %p3542_p0 }
  0x35   : > { %p3538_p11 = pneg %p3537_p9 }
  0x37   : > { %p3545_p10 = pnand %p3544_p5, %p3538_p11 }
  0x39   : > { %3548 = shalt.err (!%p3545_p10)
}
  0x3a   : > { %3269 = dma.hbm_to_vmem [thread:$0]  (!%p3847_p12), %s4668_s4, 512, %s316_s22, [#allocation5], %s3718_s30, %s3718_s30, %s3719_s14  }
  0x3b   : > { %s3720_s28 = smov [#allocation9]   ;;  %s3721_s15 = smov [#allocation12]  }
  0x3c   : > { %s345_s12 = sshll.u32 %s3720_s28, 4  ;;  %s369_s16 = sshll.u32 %s3721_s15, 4  ;;  %s346_s12 = int_to_ptr.vmem [resolvable:$true] %s345_s12  ;;  %s370_s16 = int_to_ptr.vmem [resolvable:$true] %s369_s16 }
  0x3d   : > { %s3560_s25 = scalar_lea.vmem %s346_s12, 16  ;;  %s3567_s26 = scalar_lea.vmem %s346_s12, 32 }
  0x3e   : > { %p3561_p9 = scmp.ne.s32.totalorder %s346_s12, %s3560_s25  ;;  %p3568_p10 = scmp.lt.s32.totalorder %s346_s12, %s346_s12 }
  0x3f   : > { %p3569_p1 = scmp.lt.s32.totalorder %s3567_s26, %s3560_s25 }
  0x40   : > { %p3563_p5 = pnand %p3561_p9, %p3853_p13 }
  0x41   : > { %p3570_p2 = por %p3569_p1, %p3568_p10 }
  0x42   : > { %p3564_p6 = pneg %p3563_p5 }
  0x44   : > { %p3571_p3 = pnand %p3570_p2, %p3564_p6 }
  0x46   : > { %3574 = shalt.err (!%p3571_p3)
}
  0x47   : > { %3275 = dma.hbm_to_vmem [thread:$0]  (!%p3847_p12), %s4671_s7, 16, %s346_s12, [#allocation8]  }
  0x48   : > { %s3586_s23 = scalar_lea.vmem %s370_s16, 512  ;;  %p3594_p11 = scmp.lt.s32.totalorder %s370_s16, %s370_s16 }
  0x49   : > { %p3587_p4 = scmp.ne.s32.totalorder %s370_s16, %s3586_s23  ;;  %p3595_p0 = scmp.lt.s32.totalorder %s3586_s23, %s3586_s23 }
  0x4b   : > { %p3589_p7 = pnand %p3587_p4, %p3853_p13  ;;  %p3596_p9 = por %p3595_p0, %p3594_p11 }
  0x4d   : > { %p3590_p8 = pneg %p3589_p7 }
  0x4f   : > { %p3597_p5 = pnand %p3596_p9, %p3590_p8 }
  0x51   : > { %3600 = shalt.err (!%p3597_p5)
}
  0x52   : > { %3281 = dma.hbm_to_vmem [thread:$0]  (!%p3847_p12), %s4674_s10, 512, %s370_s16, [#allocation11], %s3718_s30, %s3718_s30, %s3719_s14  }
  0x53   : > { %p4697_p6 = scmp.ne.s32.totalorder %s4694_s29, 0 }
  0x55   : > { %393 = sbr.rel (%p4697_p6) target bundleno = 2768 (0xad0), region = 64 }
  0x5a   : > { %p4698_p13 = scmp.eq.s32.totalorder %s3811_s21, 0 }
  0x5c   : > { %3664 = dma.done.wait (%p4698_p13), [#allocation5], 512   ;;  %p4699_p10 = pmov %p4698_p13 }
  0x5e   : > { %3666 = vsyncadd (%p4699_p10), [#allocation5], 4294966784  ;;  %p4700_p1 = pmov %p4699_p10 }
  0x60   : > { %3668 = dma.done.wait (%p4700_p1), [#allocation8], 528   ;;  %p4701_p2 = pmov %p4700_p1 }
  0x61   : > { %p4702_p3 = pmov %p4700_p1 }
  0x62   : > { %3670 = vsyncadd (%p4701_p2), [#allocation8], 4294966768 }
  0x63   : > { %3672 = dma.done.wait (%p4702_p3), [#allocation11], 528   ;;  %p4703_p12 = pmov %p4700_p1 }
  0x64   : > { %s446_s29 = sand.u32 1, %s3685_s18   ;;  %p449_p4 = scmp.lt.s32.totalorder %s3811_s21, 1  ;;  %v3925_v0 = vld [vmem:[%s4665_s1] ss:$0 sm:$0xff]  ;;  %v3939_v4 = vld [vmem:[#allocation10] ss:$0 sm:$0xff] }
  0x65   : > { %3674 = vsyncadd (%p4703_p12), [#allocation11], 4294966768  ;;  %s3918_s13 = sshll.u32 %s446_s29, 5  ;;  %v3930_v1 = vld [vmem:[%s4666_s2] ss:$0 sm:$0xff]  ;;  %4704 = vst [vmem:[#allocation22_spill] sm:$0xff] %v3939_v4 }
  0x66   : > { %s450_s24 = scalar_select %p449_p4, %s3811_s21, 1  ;;  %v3935_v2 = vld [vmem:[%s4669_s5] ss:$0 sm:$0xff]  ;;  %v3949_v6 = vld [vmem:[%s4667_s3 + $0x8] sm:$0xff]  ;;  %v3954_v7 = vld [vmem:[%s4667_s3 + $0x10] sm:$0xff] }
  0x67   : > { %v3937_v3 = vld [vmem:[#allocation9] ss:$0 sm:$0xff]  ;;  %4706 = vst [vmem:[#allocation24_spill] sm:$0xff] %v3949_v6  ;;  %4707 = vst [vmem:[#allocation25_spill] sm:$0xff] %v3954_v7  ;;  %v3959_v8 = vld [vmem:[%s4667_s3 + $0x18] sm:$0xff]  ;;  %s4029_s30 = scalar_lea.vmem [#allocation13], %s3918_s13 }
  0x68   : > { %v3944_v5 = vld [vmem:[%s4667_s3] sm:$0xff]  ;;  %4708 = vst [vmem:[#allocation26_spill] sm:$0xff] %v3959_v8  ;;  %s2912_s16 = sshll.u32 %s450_s24, 5  ;;  %v3963_v10 = vld [vmem:[#allocation4 + $0x8] sm:$0xff]  ;;  %v3965_v11 = vld [vmem:[#allocation4 + $0x10] sm:$0xff]  ;;  %s4039_s14 = smov 0  }
  0x69   : > { %4705 = vst [vmem:[#allocation23_spill] sm:$0xff] %v3944_v5  ;;  %v3961_v9 = vld [vmem:[#allocation4] sm:$0xff]  ;;  %v3967_v12 = vld [vmem:[#allocation4 + $0x18] sm:$0xff]  ;;  %v3971_v14 = vld [vmem:[#allocation7 + $0x8] sm:$0xff]  ;;  %s453_s22 = scalar_lea.vmem %s4664_s0, %s2912_s16 }
  0x6a   : > { %v3969_v13 = vld [vmem:[#allocation7] sm:$0xff]  ;;  %v3973_v15 = vld [vmem:[#allocation7 + $0x10] sm:$0xff]  ;;  %v3975_v16 = vld [vmem:[#allocation7 + $0x18] sm:$0xff] }
  0x6b   : > { %v3980_v17 = vld [vmem:[%s4672_s8] sm:$0xff]  ;;  %v3988_v18 = vld [vmem:[%s4672_s8 + $0x8] sm:$0xff]  ;;  %v3993_v19 = vld [vmem:[%s4672_s8 + $0x10] sm:$0xff] }
  0x6c   : > { %v3998_v20 = vld [vmem:[%s4672_s8 + $0x18] sm:$0xff]  ;;  %v4003_v21 = vld [vmem:[%s4672_s8 + $0x20] sm:$0xff]  ;;  %v4008_v22 = vld [vmem:[%s4672_s8 + $0x28] sm:$0xff] }
  0x6d   : > { %v4013_v23 = vld [vmem:[%s4672_s8 + $0x30] sm:$0xff]  ;;  %v4018_v24 = vld [vmem:[%s4672_s8 + $0x38] sm:$0xff]  ;;  %v4020_v25 = vld [vmem:[#allocation12] sm:$0xff] }
  0x6e   : > { %v4022_v26 = vld [vmem:[#allocation12 + $0x8] sm:$0xff]  ;;  %v4024_v27 = vld [vmem:[#allocation12 + $0x10] sm:$0xff]  ;;  %v4026_v28 = vld [vmem:[#allocation12 + $0x18] sm:$0xff] }
  0x6f   : > { %v513_v29 = vld [vmem:[%s453_s22] sm:$0xff]   ;;  %v514_v30 = vld [vmem:[%s453_s22 + $0x8] sm:$0xff]   ;;  %v515_v31 = vld [vmem:[%s453_s22 + $0x10] sm:$0xff]  }
  0x70   : > { %v516_v32 = vld [vmem:[%s453_s22 + $0x18] sm:$0xff]  }
  0x71 LB: >> { %v4709_v8 = vld [vmem:[#allocation26_spill] sm:$0xff]  ;;  %v4710_v7 = vld [vmem:[#allocation25_spill] sm:$0xff]  ;;  %v4711_v6 = vld [vmem:[#allocation24_spill] sm:$0xff]  ;;  %vm527_vm0 = vcmask 261120   ;;  %vm686_vm1 = vcmask 785408   ;;  %vm695_vm2 = vcmask 195584   ;;  %v3709_v29 = vphi %v513_v29, %v4717_v29   ;;  %v3705_v30 = vphi %v514_v30, %v4716_v30   ;;  %v3701_v31 = vphi %v515_v31, %v4715_v31   ;;  %v3697_v32 = vphi %v516_v32, %v4714_v32   ;;  %s3713_s14 = sphi %s4039_s14, %s522_s14  }
  0x72   : >> { %v4712_v5 = vld [vmem:[#allocation23_spill] sm:$0xff]  ;;  %3034 = vmatprep.subr.mxu0 %v4709_v8  ;;  %v528_v33 = vsel %vm527_vm0, %v3709_v29, 0.0  ;;  %v534_v34 = vsel %vm527_vm0, %v3701_v31, 0.0  ;;  %v531_v35 = vsel %vm527_vm0, %v3705_v30, 0.0  ;;  %v537_v36 = vsel %vm527_vm0, %v3697_v32, 0.0  ;;  %s3722_s13 = smov 56  }
  0x73   : >> { %3035 = vmatpush3.msra.mxu0 %v4709_v8  ;;  %529 = vadd.xlane.f32.xlu0 %v528_v33  ;;  %s3723_s22 = smov 80   ;;  %vm800_vm3 = vcmask 64512   ;;  %s3724_s12 = smov 104   ;;  %vm2551_vm4 = vcmask 523264  }
  0x74   : >> { %3036 = vmatprep.subr.mxu0 %v4710_v7  ;;  %535 = vadd.xlane.f32.xlu1 %v534_v34  ;;  %s3725_s25 = smov 120   ;;  %s3726_s26 = smov 112  }
  0x75   : >> { %3037 = vmatpush3.msra.mxu0 %v4710_v7  ;;  %s522_s14 = sadd.s32 1, %s3713_s14  }
  0x76   : >> { %3038 = vmatprep.subr.mxu0 %v4711_v6  ;;  %p519_p7 = scmp.ge.s32.totalorder %s522_s14, 2  }
  0x77   : >> { %3039 = vmatpush3.msra.mxu0 %v4711_v6  ;;  %532 = vadd.xlane.f32.xlu0 %v531_v35  ;;  %s2913_s16 = sshll.u32 (%p519_p7), %s3811_s21, 9  ;;  %s2676_s28 = sshll.u32 (%p519_p7), %s4029_s30, 4  ;;  %s4620_s28 = int_to_ptr.vmem [resolvable:$true] %s2676_s28 }
  0x78   : >> { %538 = vadd.xlane.f32.xlu1 %v537_v36  ;;  %3040 = vmatprep.subr.mxu0 %v4712_v5  ;;  %s4617_s23 = scalar_lea.hbm (%p519_p7), %s4675_s11, %s2913_s16  ;;  %s4624_s15 = scalar_lea.sflag (%p519_p7), [#allocation6], %s446_s29 }
  0x79   : >> { %3041 = vmatpush3.msra.mxu0 %v4712_v5  ;;  %s3601_s14 = scalar_lea.vmem (%p519_p7), %s4620_s28, 512  ;;  %p4718_p11 = scmp.ne.s32.totalorder (%p519_p7), %s4691_s27, 0 }
  0x7a   : > { %p3602_p8 = scmp.ne.s32.totalorder (%p519_p7), %s4620_s28, %s3601_s14  ;;  %s3727_s21 = smov (%p519_p7), [#allocation13]  }
  0x7c   : > { %p3603_p0 = pnand (%p519_p7), %p3602_p8, %p4718_p11 }
  0x7e   : > { %p3604_p9 = pneg (%p519_p7), %p3603_p0 }
  0xfc   : >> { %v530_v37 = vpop.xlane.xlu0 %529 }
  0xfd   : >> { %v536_v38 = vpop.xlane.xlu1 %535  ;;  %v541_v39 = vmul.f32 0.03125, %v530_v37 }
  0xfe   : >> { %v543_v40 = vmul.f32 0.03125, %v536_v38 }
  0xff   : >> { %v545_v41 = vsub.f32 %v3709_v29, %v541_v39 }
 0x100   : >> { %v547_v42 = vsub.f32 %v3701_v31, %v543_v40  ;;  %v533_v43 = vpop.xlane.xlu0 %532 }
 0x101   : >> { %v539_v44 = vpop.xlane.xlu1 %538  ;;  %v542_v45 = vmul.f32 0.03125, %v533_v43  ;;  %v549_v46 = vmul.f32 %v545_v41, %v545_v41 }
 0x102   : >> { %v544_v47 = vmul.f32 0.03125, %v539_v44  ;;  %v551_v48 = vmul.f32 %v547_v42, %v547_v42 }
 0x103   : >> { %v546_v49 = vsub.f32 %v3705_v30, %v542_v45  ;;  %v553_v50 = vsel %vm527_vm0, %v549_v46, 0.0 }
 0x104   : >> { %v548_v51 = vsub.f32 %v3697_v32, %v544_v47  ;;  %554 = vadd.xlane.f32.xlu0 %v553_v50  ;;  %v559_v52 = vsel %vm527_vm0, %v551_v48, 0.0 }
 0x105   : >> { %v550_v53 = vmul.f32 %v546_v49, %v546_v49 }
 0x106   : >> { %v552_v54 = vmul.f32 %v548_v51, %v548_v51 }
 0x107   : >> { %v556_v55 = vsel %vm527_vm0, %v550_v53, 0.0 }
 0x108   : >> { %560 = vadd.xlane.f32.xlu0 %v559_v52  ;;  %557 = vadd.xlane.f32.xlu1 %v556_v55  ;;  %v562_v56 = vsel %vm527_vm0, %v552_v54, 0.0 }
 0x10c   : >> { %563 = vadd.xlane.f32.xlu1 %v562_v56 }
 0x18d   : >> { %v555_v57 = vpop.xlane.xlu0 %554 }
 0x18e   : >> { %v565_v58 = vmul.f32 0.03125, %v555_v57 }
 0x190   : >> { %v569_v59 = vadd.f32 1e-05, %v565_v58 }
 0x191   : >> { %v561_v60 = vpop.xlane.xlu0 %560  ;;  %v558_v61 = vpop.xlane.xlu1 %557 }
 0x192   : >> { %3383 = vrsqrt.f32 %v569_v59  ;;  %v567_v62 = vmul.f32 0.03125, %v561_v60  ;;  %v566_v63 = vmul.f32 0.03125, %v558_v61 }
 0x194   : >> { %v571_v33 = vadd.f32 1e-05, %v567_v62  ;;  %v570_v34 = vadd.f32 1e-05, %v566_v63 }
 0x195   : >> { %v564_v35 = vpop.xlane.xlu1 %563 }
 0x196   : >> { %3385 = vrsqrt.f32 %v571_v33  ;;  %v568_v36 = vmul.f32 0.03125, %v564_v35 }
 0x197   : >> { %3387 = vrsqrt.f32 %v570_v34 }
 0x198   : >> { %v572_v37 = vadd.f32 1e-05, %v568_v36 }
 0x19a   : >> { %3389 = vrsqrt.f32 %v572_v37 }
 0x19f   : >> { %v3384_v38 = vpop.eup %3383 }
 0x1a0   : >> { %v577_v39 = vmul.f32 %v3384_v38, %v545_v41 }
 0x1a2   : >> { %v581_v40 = vmul.f32 %v3925_v0, %v577_v39 }
 0x1a3   : >> { %v3386_v43 = vpop.eup %3385 }
 0x1a4   : >> { %v3388_v44 = vpop.eup %3387  ;;  %v585_v45 = vadd.f32 %v3930_v1, %v581_v40  ;;  %v579_v46 = vmul.f32 %v3386_v43, %v547_v42 }
 0x1a5   : >> { %v578_v47 = vmul.f32 %v3388_v44, %v546_v49 }
 0x1a6   : >> { %3042 = vmatprep.mubr.msk.f32.mxu0 %vm527_vm0, %v585_v45  ;;  %v583_v48 = vmul.f32 %v3925_v0, %v579_v46 }
 0x1a7   : >> { %v3390_v50 = vpop.eup %3389  ;;  %v582_v52 = vmul.f32 %v3925_v0, %v578_v47 }
 0x1a8   : >> { %v587_v53 = vadd.f32 %v3930_v1, %v583_v48  ;;  %v580_v54 = vmul.f32 %v3390_v50, %v548_v51 }
 0x1a9   : >> { %v586_v41 = vadd.f32 %v3930_v1, %v582_v52 }
 0x1aa   : >> { %v584_v55 = vmul.f32 %v3925_v0, %v580_v54 }
 0x1ab   : >> { %3043 = vmatmul.mubr.msk.f32.vlgmr.msra.gmra.mxu0 %vm527_vm0, %v586_v41 }
 0x1ac   : >> { %3045 = vmatprep.mubr.msk.f32.mxu0 %vm527_vm0, %v587_v53  ;;  %v588_v42 = vadd.f32 %v3930_v1, %v584_v55 }
 0x1af   : >> { %3046 = vmatmul.mubr.msk.f32.gmra.mxu0 %vm527_vm0, %v588_v42 }
 0x26b   : >> { %v3044_v49 = vpop.f32.mrf.mxu0 }
 0x26c   : >> { %688 = vst.msk [vmem:[#allocation2 + $0x8] sm:$0xff] %vm686_vm1, %v3044_v49 }
 0x26d   : >> { %v667_v56 = vpop.f32.mrf.mxu0 }
 0x26e   : >> { %687 = vst.msk [vmem:[#allocation2] sm:$0xff] %vm686_vm1, %v667_v56 }
 0x26f   : >> { %v3047_v57 = vpop.f32.mrf.mxu0 }
 0x270   : >> { %690 = vst.msk [vmem:[#allocation2 + $0x18] sm:$0xff] %vm686_vm1, %v3047_v57 }
 0x271   : >> { %v677_v51 = vpop.f32.mrf.mxu0 }
 0x272   : >> { %689 = vst.msk [vmem:[#allocation2 + $0x10] sm:$0xff] %vm686_vm1, %v677_v51 }
 0x273   : >> { %v692_v58 = vld [vmem:[#allocation2 + $0x8] sm:$0xff] }
 0x274   : >> { %697 = vst.msk [vmem:[#allocation3 + $0x20] sm:$0xff] %vm695_vm2, %v692_v58  ;;  %758 = vrot.lane.b32.xlu1 %v692_v58, %s3722_s13 }
 0x275   : >> { %v691_v59 = vld [vmem:[#allocation2] sm:$0xff] }
 0x276   : >> { %696 = vst.msk [vmem:[#allocation3] sm:$0xff] %vm695_vm2, %v691_v59  ;;  %756 = vrot.lane.b32.xlu0 %v691_v59, %s3722_s13 }
 0x277   : >> { %v694_v60 = vld [vmem:[#allocation2 + $0x18] sm:$0xff] }
 0x278   : >> { %699 = vst.msk [vmem:[#allocation3 + $0x60] sm:$0xff] %vm695_vm2, %v694_v60  ;;  %732 = vrot.lane.b32.xlu1 %v691_v59, %s3723_s22 }
 0x279   : >> { %v693_v61 = vld [vmem:[#allocation2 + $0x10] sm:$0xff] }
 0x27a   : >> { %698 = vst.msk [vmem:[#allocation3 + $0x40] sm:$0xff] %vm695_vm2, %v693_v61  ;;  %708 = vrot.lane.b32.xlu0 %v691_v59, %s3724_s12 }
 0x27b   : >> { %v4096_v62 = vld [vmem:[#allocation3 + $0x20] sm:$0xff] }
 0x27c   : >> { %734 = vrot.lane.b32.xlu1 %v692_v58, %s3723_s22  ;;  %3070 = vmatprep.mubr.msk.f32.mxu0 %vm800_vm3, %v4096_v62 }
 0x27d   : >> { %v4100_v63 = vld [vmem:[#allocation3] sm:$0xff] }
 0x27e   : >> { %3056 = vmatprep.mubr.msk.f32.mxu1 %vm800_vm3, %v4100_v63  ;;  %760 = vrot.lane.b32.xlu0 %v693_v61, %s3722_s13 }
 0x280   : >> { %710 = vrot.lane.b32.xlu1 %v692_v58, %s3724_s12  ;;  %v4172_v58 = vld [vmem:[#allocation3 + $0x60] sm:$0xff] }
 0x281   : >> { %v4168_v51 = vld [vmem:[#allocation3 + $0x40] sm:$0xff] }
 0x282   : >> { %736 = vrot.lane.b32.xlu0 %v693_v61, %s3723_s22 }
 0x284   : >> { %762 = vrot.lane.b32.xlu1 %v694_v60, %s3722_s13  ;;  %s3605_s13 = sshll.u32 (%p519_p7), %s3727_s21, 4  ;;  %s3606_s13 = int_to_ptr.vmem [resolvable:$false] %s3605_s13 }
 0x285   : > { %p3608_p5 = scmp.lt.s32.totalorder (%p519_p7), %s4620_s28, %s3606_s13 }
 0x286   : >> { %712 = vrot.lane.b32.xlu0 %v693_v61, %s3724_s12 }
 0x288   : >> { %738 = vrot.lane.b32.xlu1 %v694_v60, %s3723_s22  ;;  %s3607_s22 = scalar_lea.vmem (%p519_p7), %s3606_s13, 1024 }
 0x289   : > { %p3609_p6 = scmp.lt.s32.totalorder (%p519_p7), %s3607_s22, %s3601_s14 }
 0x28b   : > { %p3610_p13 = por (%p519_p7), %p3609_p6, %p3608_p5 }
 0x28c   : >> { %714 = vrot.lane.b32.xlu1 %v694_v60, %s3724_s12 }
 0x28d   : > { %p3611_p10 = pnand (%p519_p7), %p3610_p13, %p3604_p9 }
 0x2e6   : >> { %v759_v33 = vpop.permute.xlu1 %758 }
 0x2e7   : >> { %769 = vst.msk [vmem:[#allocation3 + $0x38] sm:$0xff] %vm695_vm2, %v759_v33 }
 0x2e8   : >> { %v757_v34 = vpop.permute.xlu0 %756 }
 0x2e9   : >> { %768 = vst.msk [vmem:[#allocation3 + $0x18] sm:$0xff] %vm695_vm2, %v757_v34 }
 0x2ea   : >> { %v733_v35 = vpop.permute.xlu1 %732 }
 0x2eb   : >> { %744 = vst.msk [vmem:[#allocation3 + $0x10] sm:$0xff] %vm695_vm2, %v733_v35 }
 0x2ec   : >> { %v709_v36 = vpop.permute.xlu0 %708 }
 0x2ed   : >> { %720 = vst.msk [vmem:[#allocation3 + $0x8] sm:$0xff] %vm695_vm2, %v709_v36 }
 0x2ee   : >> { %v735_v37 = vpop.permute.xlu1 %734  ;;  %v4108_v38 = vld [vmem:[#allocation3 + $0x38] sm:$0xff] }
 0x2ef   : >> { %745 = vst.msk [vmem:[#allocation3 + $0x30] sm:$0xff] %vm695_vm2, %v735_v37  ;;  %912 = vrot.lane.b32.xlu1 %v4108_v38, %s3725_s25 }
 0x2f0   : >> { %v761_v39 = vpop.permute.xlu0 %760  ;;  %v4113_v40 = vld [vmem:[#allocation3 + $0x18] sm:$0xff] }
 0x2f1   : >> { %770 = vst.msk [vmem:[#allocation3 + $0x58] sm:$0xff] %vm695_vm2, %v761_v39  ;;  %798 = vrot.lane.b32.xlu0 %v4113_v40, %s3725_s25 }
 0x2f2   : >> { %v711_v43 = vpop.permute.xlu1 %710  ;;  %v4119_v45 = vld [vmem:[#allocation3 + $0x10] sm:$0xff] }
 0x2f3   : >> { %721 = vst.msk [vmem:[#allocation3 + $0x28] sm:$0xff] %vm695_vm2, %v711_v43 }
 0x2f4   : >> { %v737_v44 = vpop.permute.xlu0 %736  ;;  %v4129_v50 = vld [vmem:[#allocation3 + $0x8] sm:$0xff] }
 0x2f5   : >> { %746 = vst.msk [vmem:[#allocation3 + $0x50] sm:$0xff] %vm695_vm2, %v737_v44  ;;  %796 = vrot.lane.b32.xlu0 %v4119_v45, %s3725_s25 }
 0x2f6   : >> { %v763_v46 = vpop.permute.xlu1 %762  ;;  %v4124_v47 = vld [vmem:[#allocation3 + $0x30] sm:$0xff] }
 0x2f7   : >> { %771 = vst.msk [vmem:[#allocation3 + $0x78] sm:$0xff] %vm695_vm2, %v763_v46  ;;  %910 = vrot.lane.b32.xlu1 %v4124_v47, %s3725_s25 }
 0x2f8   : >> { %v713_v48 = vpop.permute.xlu0 %712  ;;  %v4144_v41 = vld [vmem:[#allocation3 + $0x58] sm:$0xff] }
 0x2f9   : >> { %722 = vst.msk [vmem:[#allocation3 + $0x48] sm:$0xff] %vm695_vm2, %v713_v48  ;;  %794 = vrot.lane.b32.xlu0 %v4129_v50, %s3725_s25 }
 0x2fa   : >> { %v739_v52 = vpop.permute.xlu1 %738  ;;  %v4134_v53 = vld [vmem:[#allocation3 + $0x28] sm:$0xff] }
 0x2fb   : >> { %747 = vst.msk [vmem:[#allocation3 + $0x70] sm:$0xff] %vm695_vm2, %v739_v52  ;;  %908 = vrot.lane.b32.xlu1 %v4134_v53, %s3725_s25 }
 0x2fc   : >> { %v4152_v42 = vld [vmem:[#allocation3 + $0x50] sm:$0xff] }
 0x2fd   : >> { %792 = vrot.lane.b32.xlu0 %v4100_v63, %s3725_s25 }
 0x2fe   : >> { %v715_v54 = vpop.permute.xlu1 %714  ;;  %v4148_v55 = vld [vmem:[#allocation3 + $0x78] sm:$0xff] }
 0x2ff   : >> { %723 = vst.msk [vmem:[#allocation3 + $0x68] sm:$0xff] %vm695_vm2, %v715_v54  ;;  %906 = vrot.lane.b32.xlu1 %v4096_v62, %s3725_s25 }
 0x300   : >> { %v4160_v56 = vld [vmem:[#allocation3 + $0x48] sm:$0xff] }
 0x301   : >> { %1025 = vrot.lane.b32.xlu0 %v4144_v41, %s3725_s25 }
 0x302   : >> { %v4156_v49 = vld [vmem:[#allocation3 + $0x70] sm:$0xff] }
 0x303   : >> { %1138 = vrot.lane.b32.xlu1 %v4148_v55, %s3725_s25 }
 0x305   : >> { %1023 = vrot.lane.b32.xlu0 %v4152_v42, %s3725_s25 }
 0x306   : >> { %v4164_v57 = vld [vmem:[#allocation3 + $0x68] sm:$0xff] }
 0x307   : >> { %1136 = vrot.lane.b32.xlu1 %v4156_v49, %s3725_s25 }
 0x309   : >> { %1021 = vrot.lane.b32.xlu0 %v4160_v56, %s3725_s25 }
 0x30b   : >> { %1134 = vrot.lane.b32.xlu1 %v4164_v57, %s3725_s25 }
 0x30d   : >> { %1019 = vrot.lane.b32.xlu0 %v4168_v51, %s3725_s25 }
 0x30f   : >> { %1132 = vrot.lane.b32.xlu1 %v4172_v58, %s3725_s25 }
 0x311   : >> { %1439 = vrot.lane.b32.xlu0 %v4113_v40, %s3726_s26 }
 0x313   : >> { %1437 = vrot.lane.b32.xlu1 %v4119_v45, %s3726_s26 }
 0x315   : >> { %1433 = vrot.lane.b32.xlu0 %v4100_v63, %s3726_s26 }
 0x317   : >> { %1435 = vrot.lane.b32.xlu1 %v4129_v50, %s3726_s26 }
 0x319   : >> { %1544 = vrot.lane.b32.xlu0 %v4134_v53, %s3726_s26 }
 0x31b   : >> { %1548 = vrot.lane.b32.xlu1 %v4108_v38, %s3726_s26 }
 0x31d   : >> { %1766 = vrot.lane.b32.xlu0 %v4148_v55, %s3726_s26 }
 0x31f   : >> { %1546 = vrot.lane.b32.xlu1 %v4124_v47, %s3726_s26 }
 0x321   : >> { %1657 = vrot.lane.b32.xlu0 %v4144_v41, %s3726_s26 }
 0x323   : >> { %1542 = vrot.lane.b32.xlu1 %v4096_v62, %s3726_s26 }
 0x327   : >> { %1655 = vrot.lane.b32.xlu1 %v4152_v42, %s3726_s26 }
 0x32b   : >> { %1653 = vrot.lane.b32.xlu1 %v4160_v56, %s3726_s26 }
 0x361   : >> { %v913_v59 = vpop.permute.xlu1 %912 }
 0x362   : >> { %3062 = vmatprep.subr.msk.mxu0 %vm800_vm3, %v913_v59 }
 0x363   : >> { %v799_v60 = vpop.permute.xlu0 %798  ;;  %3063 = vmatpush3.xpose.msk.msra.mxu0 %vm800_vm3, %v913_v59 }
 0x364   : >> { %3048 = vmatprep.subr.msk.mxu1 %vm800_vm3, %v799_v60 }
 0x365   : >> { %3049 = vmatpush3.xpose.msk.msra.mxu1 %vm800_vm3, %v799_v60 }
 0x367   : >> { %v797_v61 = vpop.permute.xlu0 %796 }
 0x368   : >> { %3050 = vmatprep.subr.msk.mxu1 %vm800_vm3, %v797_v61 }
 0x369   : >> { %3051 = vmatpush3.xpose.msk.msra.mxu1 %vm800_vm3, %v797_v61  ;;  %v911_v62 = vpop.permute.xlu1 %910 }
 0x36a   : >> { %3064 = vmatprep.subr.msk.mxu0 %vm800_vm3, %v911_v62 }
 0x36b   : >> { %v795_v63 = vpop.permute.xlu0 %794  ;;  %3065 = vmatpush3.xpose.msk.msra.mxu0 %vm800_vm3, %v911_v62 }
 0x36c   : >> { %3052 = vmatprep.subr.msk.mxu1 %vm800_vm3, %v795_v63 }
 0x36d   : >> { %3053 = vmatpush3.xpose.msk.msra.mxu1 %vm800_vm3, %v795_v63  ;;  %v909_v33 = vpop.permute.xlu1 %908 }
 0x36e   : >> { %3066 = vmatprep.subr.msk.mxu0 %vm800_vm3, %v909_v33 }
 0x36f   : >> { %v793_v34 = vpop.permute.xlu0 %792  ;;  %3067 = vmatpush3.xpose.msk.msra.mxu0 %vm800_vm3, %v909_v33 }
 0x370   : >> { %3054 = vmatprep.subr.msk.mxu1 %vm800_vm3, %v793_v34 }
 0x371   : >> { %3055 = vmatpush3.xpose.msk.msra.mxu1 %vm800_vm3, %v793_v34  ;;  %v907_v35 = vpop.permute.xlu1 %906 }
 0x372   : >> { %3068 = vmatprep.subr.msk.mxu0 %vm800_vm3, %v907_v35 }
 0x373   : >> { %v1026_v36 = vpop.permute.xlu0 %1025  ;;  %3069 = vmatpush3.xpose.msk.msra.mxu0 %vm800_vm3, %v907_v35 }
 0x374   : >> { %3057 = vmatmul.mubr.msk.f32.vlgmr.msra.gmra.mxu1 %vm800_vm3, %v4129_v50  ;;  %3076 = vmatprep.subr.msk.mxu1 %vm800_vm3, %v1026_v36 }
 0x375   : >> { %3059 = vmatprep.mubr.msk.f32.mxu1 %vm800_vm3, %v4119_v45  ;;  %3077 = vmatpush3.xpose.msk.msra.mxu1 %vm800_vm3, %v1026_v36  ;;  %v1139_v37 = vpop.permute.xlu1 %1138 }
 0x376   : >> { %3071 = vmatmul.mubr.msk.f32.vlgmr.msra.gmra.mxu0 %vm800_vm3, %v4134_v53  ;;  %3090 = vmatprep.subr.msk.mxu0 %vm800_vm3, %v1139_v37 }
 0x377   : >> { %v1024_v39 = vpop.permute.xlu0 %1023  ;;  %3073 = vmatprep.mubr.msk.f32.mxu0 %vm800_vm3, %v4124_v47  ;;  %3091 = vmatpush3.xpose.msk.msra.mxu0 %vm800_vm3, %v1139_v37 }
 0x378   : >> { %3060 = vmatmul.mubr.msk.f32.gmra.mxu1 %vm800_vm3, %v4113_v40  ;;  %3078 = vmatprep.subr.msk.mxu1 %vm800_vm3, %v1024_v39 }
 0x379   : >> { %3079 = vmatpush3.xpose.msk.msra.mxu1 %vm800_vm3, %v1024_v39  ;;  %3084 = vmatprep.mubr.msk.f32.mxu1 %vm800_vm3, %v4168_v51  ;;  %v1137_v43 = vpop.permute.xlu1 %1136 }
 0x37a   : >> { %3074 = vmatmul.mubr.msk.f32.gmra.mxu0 %vm800_vm3, %v4108_v38  ;;  %3092 = vmatprep.subr.msk.mxu0 %vm800_vm3, %v1137_v43 }
 0x37b   : >> { %v1022_v44 = vpop.permute.xlu0 %1021  ;;  %3093 = vmatpush3.xpose.msk.msra.mxu0 %vm800_vm3, %v1137_v43  ;;  %3098 = vmatprep.mubr.msk.f32.mxu0 %vm800_vm3, %v4172_v58 }
 0x37c   : >> { %3080 = vmatprep.subr.msk.mxu1 %vm800_vm3, %v1022_v44 }
 0x37d   : >> { %3081 = vmatpush3.xpose.msk.msra.mxu1 %vm800_vm3, %v1022_v44  ;;  %v1135_v40 = vpop.permute.xlu1 %1134 }
 0x37e   : >> { %3094 = vmatprep.subr.msk.mxu0 %vm800_vm3, %v1135_v40 }
 0x37f   : >> { %v1020_v45 = vpop.permute.xlu0 %1019  ;;  %3095 = vmatpush3.xpose.msk.msra.mxu0 %vm800_vm3, %v1135_v40 }
 0x380   : >> { %3082 = vmatprep.subr.msk.mxu1 %vm800_vm3, %v1020_v45 }
 0x381   : >> { %3083 = vmatpush3.xpose.msk.msra.mxu1 %vm800_vm3, %v1020_v45  ;;  %v1133_v38 = vpop.permute.xlu1 %1132 }
 0x382   : >> { %3096 = vmatprep.subr.msk.mxu0 %vm800_vm3, %v1133_v38 }
 0x383   : >> { %v1440_v46 = vpop.permute.xlu0 %1439  ;;  %3097 = vmatpush3.xpose.msk.msra.mxu0 %vm800_vm3, %v1133_v38 }
 0x384   : >> { %3085 = vmatmul.mubr.msk.f32.vlgmr.msra.gmra.mxu1 %vm800_vm3, %v4160_v56  ;;  %3104 = vmatprep.subr.mxu1 %v1440_v46 }
 0x385   : >> { %3087 = vmatprep.mubr.msk.f32.mxu1 %vm800_vm3, %v4152_v42  ;;  %3105 = vmatpush3.msra.mxu1 %v1440_v46  ;;  %v1438_v47 = vpop.permute.xlu1 %1437 }
 0x386   : >> { %3099 = vmatmul.mubr.msk.f32.vlgmr.msra.gmra.mxu0 %vm800_vm3, %v4164_v57  ;;  %3106 = vmatprep.subr.mxu1 %v1438_v47 }
 0x387   : >> { %v1434_v48 = vpop.permute.xlu0 %1433  ;;  %3101 = vmatprep.mubr.msk.f32.mxu0 %vm800_vm3, %v4156_v49  ;;  %3107 = vmatpush3.msra.mxu1 %v1438_v47 }
 0x388   : >> { %3088 = vmatmul.mubr.msk.f32.gmra.mxu1 %vm800_vm3, %v4144_v41 }
 0x389   : >> { %v1436_v50 = vpop.permute.xlu1 %1435 }
 0x38a   : >> { %3102 = vmatmul.mubr.msk.f32.gmra.mxu0 %vm800_vm3, %v4148_v55  ;;  %3108 = vmatprep.subr.mxu1 %v1436_v50 }
 0x38b   : >> { %v1545_v52 = vpop.permute.xlu0 %1544  ;;  %3109 = vmatpush3.msra.mxu1 %v1436_v50 }
 0x38c   : >> { %3110 = vmatprep.subr.mxu1 %v1434_v48 }
 0x38d   : >> { %3111 = vmatpush3.msra.mxu1 %v1434_v48  ;;  %v1549_v53 = vpop.permute.xlu1 %1548 }
 0x38e   : >> { %3118 = vmatprep.subr.mxu0 %v1549_v53 }
 0x38f   : >> { %v4260_v54 = vpop.permute.xlu0 %1766  ;;  %3119 = vmatpush3.msra.mxu0 %v1549_v53 }
 0x391   : >> { %v1547_v42 = vpop.permute.xlu1 %1546 }
 0x392   : >> { %3120 = vmatprep.subr.mxu0 %v1547_v42 }
 0x393   : >> { %v4262_v56 = vpop.permute.xlu0 %1657  ;;  %3121 = vmatpush3.msra.mxu0 %v1547_v42 }
 0x394   : >> { %3122 = vmatprep.subr.mxu0 %v1545_v52  ;;  %3132 = vmatprep.subr.mxu1 %v4262_v56 }
 0x395   : >> { %3123 = vmatpush3.msra.mxu0 %v1545_v52  ;;  %v1543_v41 = vpop.permute.xlu1 %1542 }
 0x396   : >> { %3124 = vmatprep.subr.mxu0 %v1543_v41 }
 0x397   : >> { %3125 = vmatpush3.msra.mxu0 %v1543_v41 }
 0x398   : >> { %3146 = vmatprep.subr.mxu0 %v4260_v54 }
 0x434   : >> { %v3058_v55 = vpop.f32.mrf.mxu1 }
 0x435   : >> { %v4266_v59 = vmul.f32 0.17677669, %v3058_v55 }
 0x436   : >> { %v883_v60 = vpop.f32.mrf.mxu1  ;;  %v3072_v61 = vpop.f32.mrf.mxu0 }
 0x437   : >> { %v4268_v62 = vmul.f32 0.17677669, %v3072_v61  ;;  %v1260_v63 = vsel %vm527_vm0, %v4266_v59, -inf  ;;  %v4278_v43 = vmul.f32 0.17677669, %v883_v60 }
 0x438   : >> { %1261 = vmax.xlane.f32.xlu1 %v1260_v63  ;;  %v996_v33 = vpop.f32.mrf.mxu0  ;;  %v3061_v36 = vpop.f32.mrf.mxu1 }
 0x439   : >> { %v4272_v34 = vmul.f32 0.17677669, %v996_v33  ;;  %v1272_v35 = vsel %vm527_vm0, %v4268_v62, -inf  ;;  %v4280_v44 = vmul.f32 0.17677669, %v3061_v36  ;;  %v1257_v47 = vsel %vm527_vm0, %v4278_v43, -inf }
 0x43a   : >> { %1273 = vmax.xlane.f32.xlu0 %v1272_v35  ;;  %v3075_v37 = vpop.f32.mrf.mxu0  ;;  %v893_v50 = vpop.f32.mrf.mxu1 }
 0x43b   : >> { %v4276_v39 = vmul.f32 0.17677669, %v3075_v37  ;;  %v1269_v40 = vsel %vm527_vm0, %v4272_v34, -inf  ;;  %v1266_v48 = vsel %vm527_vm0, %v4280_v44, -inf  ;;  %v4292_v52 = vmul.f32 0.17677669, %v893_v50 }
 0x43c   : >> { %v1006_v38 = vpop.f32.mrf.mxu0 }
 0x43d   : >> { %v1278_v45 = vsel %vm527_vm0, %v4276_v39, -inf  ;;  %v4286_v46 = vmul.f32 0.17677669, %v1006_v38  ;;  %v1263_v33 = vsel %vm527_vm0, %v4292_v52, -inf }
 0x43e   : >> { %1270 = vmax.xlane.f32.xlu0 %v1269_v40  ;;  %1279 = vmax.xlane.f32.xlu1 %v1278_v45 }
 0x43f   : >> { %v1275_v53 = vsel %vm527_vm0, %v4286_v46, -inf }
 0x442   : >> { %1258 = vmax.xlane.f32.xlu0 %v1257_v47  ;;  %1267 = vmax.xlane.f32.xlu1 %v1266_v48 }
 0x444   : >> { %v3086_v42 = vpop.f32.mrf.mxu1 }
 0x445   : >> { %v4298_v61 = vmul.f32 0.17677669, %v3086_v42 }
 0x446   : >> { %1276 = vmax.xlane.f32.xlu0 %v1275_v53  ;;  %v3100_v41 = vpop.f32.mrf.mxu0  ;;  %v1109_v36 = vpop.f32.mrf.mxu1 }
 0x447   : >> { %v4296_v55 = vmul.f32 0.17677669, %v3100_v41  ;;  %v4306_v40 = vmul.f32 0.17677669, %v1109_v36  ;;  %v1284_v38 = vsel %vm527_vm0, %v4298_v61, -inf }
 0x448   : >> { %v1222_v60 = vpop.f32.mrf.mxu0  ;;  %v3089_v48 = vpop.f32.mrf.mxu1 }
 0x449   : >> { %v4300_v63 = vmul.f32 0.17677669, %v1222_v60  ;;  %v1296_v35 = vsel %vm527_vm0, %v4296_v55, -inf  ;;  %v4314_v53 = vmul.f32 0.17677669, %v3089_v48  ;;  %v1281_v41 = vsel %vm527_vm0, %v4306_v40, -inf }
 0x44a   : >> { %1264 = vmax.xlane.f32.xlu0 %v1263_v33  ;;  %1297 = vmax.xlane.f32.xlu1 %v1296_v35  ;;  %v3103_v37 = vpop.f32.mrf.mxu0  ;;  %v1119_v33 = vpop.f32.mrf.mxu1 }
 0x44b   : >> { %v4308_v45 = vmul.f32 0.17677669, %v3103_v37  ;;  %v1293_v47 = vsel %vm527_vm0, %v4300_v63, -inf  ;;  %v4322_v35 = vmul.f32 0.17677669, %v1119_v33  ;;  %v1290_v36 = vsel %vm527_vm0, %v4314_v53, -inf }
 0x44c   : >> { %v1232_v50 = vpop.f32.mrf.mxu0 }
 0x44d   : >> { %v4316_v42 = vmul.f32 0.17677669, %v1232_v50  ;;  %v1302_v60 = vsel %vm527_vm0, %v4308_v45, -inf }
 0x44e   : >> { %1285 = vmax.xlane.f32.xlu1 %v1284_v38  ;;  %1294 = vmax.xlane.f32.xlu0 %v1293_v47  ;;  %v1287_v38 = vsel %vm527_vm0, %v4322_v35, -inf  ;;  %v4334_v47 = vpop.permute.xlu1 %1655 }
 0x44f   : >> { %v1299_v37 = vsel %vm527_vm0, %v4316_v42, -inf }
 0x452   : >> { %1282 = vmax.xlane.f32.xlu0 %v1281_v41  ;;  %1303 = vmax.xlane.f32.xlu1 %v1302_v60  ;;  %v4336_v48 = vpop.permute.xlu1 %1653 }
 0x456   : >> { %1291 = vmax.xlane.f32.xlu1 %v1290_v36  ;;  %1300 = vmax.xlane.f32.xlu0 %v1299_v37 }
 0x45a   : >> { %1288 = vmax.xlane.f32.xlu0 %v1287_v38 }
 0x467   : >> { %1651 = vrot.lane.b32.xlu1 %v4168_v51, %s3726_s26 }
 0x470   : >> { %1764 = vrot.lane.b32.xlu0 %v4156_v49, %s3726_s26 }
 0x4c1   : >> { %v1262_v50 = vpop.xlane.xlu1 %1261 }
 0x4c2   : >> { %v1306_v41 = vsub.f32 %v4266_v59, %v1262_v50 }
 0x4c3   : >> { %v1274_v60 = vpop.xlane.xlu0 %1273 }
 0x4c4   : >> { %v1310_v33 = vsub.f32 %v4268_v62, %v1274_v60  ;;  %v1323_v36 = vmul.f32 1.442695, %v1306_v41 }
 0x4c6   : >> { %v1331_v37 = vmul.f32 1.442695, %v1310_v33 }
 0x4c7   : >> { %v1271_v5 = vpop.xlane.xlu0 %1270  ;;  %v1280_v38 = vpop.xlane.xlu1 %1279 }
 0x4c8   : >> { %3391 = vpow2.f32 %v1331_v37  ;;  %v1309_v51 = vsub.f32 %v4272_v34, %v1271_v5  ;;  %v1312_v6 = vsub.f32 %v4276_v39, %v1280_v38 }
 0x4c9   : >> { %3393 = vpow2.f32 %v1323_v36 }
 0x4ca   : >> { %v1329_v49 = vmul.f32 1.442695, %v1309_v51  ;;  %v1335_v7 = vmul.f32 1.442695, %v1312_v6 }
 0x4cb   : >> { %v1259_v8 = vpop.xlane.xlu0 %1258  ;;  %v1268_v4 = vpop.xlane.xlu1 %1267 }
 0x4cc   : >> { %3395 = vpow2.f32 %v1329_v49  ;;  %v1305_v59 = vsub.f32 %v4278_v43, %v1259_v8  ;;  %v1308_v50 = vsub.f32 %v4280_v44, %v1268_v4 }
 0x4cd   : >> { %3397 = vpow2.f32 %v1335_v7 }
 0x4ce   : >> { %v1321_v62 = vmul.f32 1.442695, %v1305_v59  ;;  %v1327_v41 = vmul.f32 1.442695, %v1308_v50 }
 0x4cf   : >> { %v1277_v60 = vpop.xlane.xlu0 %1276 }
 0x4d0   : >> { %3399 = vpow2.f32 %v1321_v62  ;;  %v1311_v33 = vsub.f32 %v4286_v46, %v1277_v60 }
 0x4d1   : >> { %3401 = vpow2.f32 %v1327_v41 }
 0x4d2   : >> { %v1333_v5 = vmul.f32 1.442695, %v1311_v33 }
 0x4d3   : >> { %v1265_v34 = vpop.xlane.xlu0 %1264  ;;  %v1298_v39 = vpop.xlane.xlu1 %1297 }
 0x4d4   : >> { %3403 = vpow2.f32 %v1333_v5  ;;  %v1307_v6 = vsub.f32 %v4292_v52, %v1265_v34  ;;  %v1318_v36 = vsub.f32 %v4296_v55, %v1298_v39 }
 0x4d5   : >> { %v4347_v37 = vpop.eup %3391 }
 0x4d6   : >> { %v1325_v8 = vmul.f32 1.442695, %v1307_v6  ;;  %v1347_v4 = vmul.f32 1.442695, %v1318_v36  ;;  %v1368_v7 = vsel %vm527_vm0, %v4347_v37, 0.0  ;;  %v4351_v43 = vpop.eup %3393 }
 0x4d7   : >> { %v1295_v44 = vpop.xlane.xlu0 %1294  ;;  %1369 = vadd.xlane.f32.xlu1 %v1368_v7  ;;  %v1286_v46 = vpop.xlane.xlu1 %1285  ;;  %v1356_v50 = vsel %vm527_vm0, %v4351_v43, 0.0 }
 0x4d8   : >> { %3405 = vpow2.f32 %v1325_v8  ;;  %v1317_v38 = vsub.f32 %v4300_v63, %v1295_v44  ;;  %v1314_v51 = vsub.f32 %v4298_v61, %v1286_v46 }
 0x4d9   : >> { %v4355_v52 = vpop.eup %3395  ;;  %3407 = vpow2.f32 %v1347_v4 }
 0x4da   : >> { %v1345_v55 = vmul.f32 1.442695, %v1317_v38  ;;  %v1339_v49 = vmul.f32 1.442695, %v1314_v51  ;;  %v1365_v59 = vsel %vm527_vm0, %v4355_v52, 0.0  ;;  %v4361_v62 = vpop.eup %3397 }
 0x4db   : >> { %v1283_v41 = vpop.xlane.xlu0 %1282  ;;  %1366 = vadd.xlane.f32.xlu0 %v1365_v59  ;;  %1357 = vadd.xlane.f32.xlu1 %v1356_v50  ;;  %v1304_v60 = vpop.xlane.xlu1 %1303  ;;  %v1374_v6 = vsel %vm527_vm0, %v4361_v62, 0.0 }
 0x4dc   : >> { %3409 = vpow2.f32 %v1345_v55  ;;  %v1313_v61 = vsub.f32 %v4306_v40, %v1283_v41  ;;  %v1320_v63 = vsub.f32 %v4308_v45, %v1304_v60 }
 0x4dd   : >> { %v4365_v33 = vpop.eup %3399  ;;  %3411 = vpow2.f32 %v1339_v49 }
 0x4de   : >> { %v1337_v5 = vmul.f32 1.442695, %v1313_v61  ;;  %v1351_v34 = vmul.f32 1.442695, %v1320_v63  ;;  %v1353_v39 = vsel %vm527_vm0, %v4365_v33, 0.0  ;;  %v4371_v36 = vpop.eup %3401 }
 0x4df   : >> { %1354 = vadd.xlane.f32.xlu0 %v1353_v39  ;;  %v1301_v8 = vpop.xlane.xlu0 %1300  ;;  %1375 = vadd.xlane.f32.xlu1 %v1374_v6  ;;  %v1292_v4 = vpop.xlane.xlu1 %1291  ;;  %v1362_v51 = vsel %vm527_vm0, %v4371_v36, 0.0 }
 0x4e0   : >> { %3413 = vpow2.f32 %v1337_v5  ;;  %v1319_v40 = vsub.f32 %v4316_v42, %v1301_v8  ;;  %v1316_v45 = vsub.f32 %v4314_v53, %v1292_v4 }
 0x4e1   : >> { %v4375_v7 = vpop.eup %3403  ;;  %3415 = vpow2.f32 %v1351_v34 }
 0x4e2   : >> { %v1349_v44 = vmul.f32 1.442695, %v1319_v40  ;;  %v1343_v46 = vmul.f32 1.442695, %v1316_v45  ;;  %v1371_v38 = vsel %vm527_vm0, %v4375_v7, 0.0 }
 0x4e3   : >> { %1372 = vadd.xlane.f32.xlu0 %v1371_v38  ;;  %v1289_v55 = vpop.xlane.xlu0 %1288  ;;  %1363 = vadd.xlane.f32.xlu1 %v1362_v51  ;;  %v4422_v38 = vpop.permute.xlu1 %1651 }
 0x4e4   : >> { %3417 = vpow2.f32 %v1349_v44  ;;  %v1315_v49 = vsub.f32 %v4322_v35, %v1289_v55 }
 0x4e5   : >> { %v4382_v42 = vpop.eup %3405  ;;  %3419 = vpow2.f32 %v1343_v46 }
 0x4e6   : >> { %v4384_v53 = vpop.eup %3407  ;;  %v1341_v59 = vmul.f32 1.442695, %v1315_v49  ;;  %v1359_v50 = vsel %vm527_vm0, %v4382_v42, 0.0 }
 0x4e7   : >> { %1360 = vadd.xlane.f32.xlu0 %v1359_v50  ;;  %v1392_v41 = vsel %vm527_vm0, %v4384_v53, 0.0  ;;  %v1765_v51 = vpop.permute.xlu0 %1764 }
 0x4e8   : >> { %3421 = vpow2.f32 %v1341_v59  ;;  %1393 = vadd.xlane.f32.xlu1 %v1392_v41 }
 0x4e9   : >> { %v4390_v60 = vpop.eup %3409 }
 0x4ea   : >> { %v4392_v61 = vpop.eup %3411  ;;  %v1389_v35 = vsel %vm527_vm0, %v4390_v60, 0.0 }
 0x4eb   : >> { %1390 = vadd.xlane.f32.xlu0 %v1389_v35  ;;  %v1380_v63 = vsel %vm527_vm0, %v4392_v61, 0.0 }
 0x4ec   : >> { %1381 = vadd.xlane.f32.xlu1 %v1380_v63 }
 0x4ed   : >> { %v4398_v5 = vpop.eup %3413 }
 0x4ee   : >> { %v4400_v34 = vpop.eup %3415  ;;  %v1377_v39 = vsel %vm527_vm0, %v4398_v5, 0.0 }
 0x4ef   : >> { %1378 = vadd.xlane.f32.xlu0 %v1377_v39  ;;  %v1398_v6 = vsel %vm527_vm0, %v4400_v34, 0.0 }
 0x4f0   : >> { %1399 = vadd.xlane.f32.xlu1 %v1398_v6 }
 0x4f1   : >> { %v4406_v8 = vpop.eup %3417 }
 0x4f2   : >> { %v4408_v4 = vpop.eup %3419  ;;  %v1395_v40 = vsel %vm527_vm0, %v4406_v8, 0.0 }
 0x4f3   : >> { %1396 = vadd.xlane.f32.xlu0 %v1395_v40  ;;  %v1386_v45 = vsel %vm527_vm0, %v4408_v4, 0.0 }
 0x4f4   : >> { %1387 = vadd.xlane.f32.xlu1 %v1386_v45 }
 0x4f5   : >> { %v4414_v44 = vpop.eup %3421 }
 0x4f6   : >> { %v1383_v46 = vsel %vm527_vm0, %v4414_v44, 0.0 }
 0x4f7   : >> { %1384 = vadd.xlane.f32.xlu0 %v1383_v46 }
 0x505   : >> { %1760 = vrot.lane.b32.xlu1 %v4172_v58, %s3726_s26 }
 0x50d   : >> { %1762 = vrot.lane.b32.xlu0 %v4164_v57, %s3726_s26 }
 0x560   : >> { %v1370_v55 = vpop.xlane.xlu1 %1369 }
 0x561   : >> { %3423 = vrcp.f32 %v1370_v55 }
 0x564   : >> { %v1367_v49 = vpop.xlane.xlu0 %1366  ;;  %v1358_v59 = vpop.xlane.xlu1 %1357 }
 0x565   : >> { %3425 = vrcp.f32 %v1367_v49 }
 0x566   : >> { %3427 = vrcp.f32 %v1358_v59 }
 0x568   : >> { %v1355_v50 = vpop.xlane.xlu0 %1354  ;;  %v1376_v41 = vpop.xlane.xlu1 %1375 }
 0x569   : >> { %3429 = vrcp.f32 %v1355_v50 }
 0x56a   : >> { %3431 = vrcp.f32 %v1376_v41 }
 0x56c   : >> { %v1373_v35 = vpop.xlane.xlu0 %1372  ;;  %v1364_v63 = vpop.xlane.xlu1 %1363 }
 0x56d   : >> { %3433 = vrcp.f32 %v1373_v35 }
 0x56e   : >> { %3435 = vrcp.f32 %v1364_v63  ;;  %v3424_v39 = vpop.eup %3423 }
 0x56f   : >> { %v1422_v45 = vmul.f32 %v3424_v39, %v4347_v37 }
 0x570   : >> { %v1361_v58 = vpop.xlane.xlu0 %1360 }
 0x571   : >> { %3437 = vrcp.f32 %v1361_v58  ;;  %v1394_v57 = vpop.xlane.xlu1 %1393 }
 0x572   : >> { %v3426_v6 = vpop.eup %3425 }
 0x573   : >> { %v1421_v40 = vmul.f32 %v3426_v6, %v4355_v52  ;;  %v3428_v55 = vpop.eup %3427 }
 0x574   : >> { %v1391_v46 = vpop.xlane.xlu0 %1390  ;;  %v1418_v41 = vmul.f32 %v3428_v55, %v4351_v43 }
 0x575   : >> { %3439 = vrcp.f32 %v1391_v46  ;;  %v1382_v49 = vpop.xlane.xlu1 %1381  ;;  %3126 = vmatprep.mubr.msk.f32.mxu0 %vm527_vm0, %v1421_v40 }
 0x576   : >> { %v3430_v59 = vpop.eup %3429  ;;  %3127 = vmatmul.mubr.msk.f32.vlgmr.msra.gmra.mxu0 %vm527_vm0, %v1422_v45  ;;  %3441 = vrcp.f32 %v1394_v57 }
 0x577   : >> { %3147 = vmatpush3.msra.mxu0 %v4260_v54  ;;  %v1417_v50 = vmul.f32 %v3430_v59, %v4365_v33  ;;  %3443 = vrcp.f32 %v1382_v49  ;;  %v3432_v37 = vpop.eup %3431 }
 0x578   : >> { %3148 = vmatprep.subr.mxu0 %v1765_v51  ;;  %v1379_v52 = vpop.xlane.xlu0 %1378  ;;  %v1424_v33 = vmul.f32 %v3432_v37, %v4361_v62 }
 0x579   : >> { %3445 = vrcp.f32 %v1379_v52  ;;  %3149 = vmatpush3.msra.mxu0 %v1765_v51  ;;  %v1400_v35 = vpop.xlane.xlu1 %1399  ;;  %3112 = vmatprep.mubr.msk.f32.mxu1 %vm527_vm0, %v1417_v50 }
 0x57a   : >> { %v3434_v63 = vpop.eup %3433  ;;  %3113 = vmatmul.mubr.msk.f32.vlgmr.msra.gmra.mxu1 %vm527_vm0, %v1418_v41  ;;  %3447 = vrcp.f32 %v1400_v35 }
 0x57b   : >> { %3133 = vmatpush3.msra.mxu1 %v4262_v56  ;;  %v1423_v54 = vmul.f32 %v3434_v63, %v4375_v7  ;;  %v3436_v58 = vpop.eup %3435 }
 0x57c   : >> { %3134 = vmatprep.subr.mxu1 %v4334_v47  ;;  %v1397_v43 = vpop.xlane.xlu0 %1396  ;;  %v1420_v7 = vmul.f32 %v3436_v58, %v4371_v36 }
 0x57d   : >> { %3449 = vrcp.f32 %v1397_v43  ;;  %3135 = vmatpush3.msra.mxu1 %v4334_v47  ;;  %v1388_v51 = vpop.xlane.xlu1 %1387  ;;  %3129 = vmatprep.mubr.msk.f32.mxu0 %vm527_vm0, %v1423_v54 }
 0x57e   : >> { %v3438_v39 = vpop.eup %3437  ;;  %3136 = vmatprep.subr.mxu1 %v4336_v48  ;;  %3130 = vmatmul.mubr.msk.f32.gmra.mxu0 %vm527_vm0, %v1424_v33  ;;  %3451 = vrcp.f32 %v1388_v51 }
 0x57f   : >> { %3137 = vmatpush3.msra.mxu1 %v4336_v48  ;;  %v1419_v56 = vmul.f32 %v3438_v39, %v4382_v42 }
 0x580   : >> { %3138 = vmatprep.subr.mxu1 %v4422_v38  ;;  %v1385_v62 = vpop.xlane.xlu0 %1384 }
 0x581   : >> { %3453 = vrcp.f32 %v1385_v62  ;;  %3139 = vmatpush3.msra.mxu1 %v4422_v38  ;;  %3115 = vmatprep.mubr.msk.f32.mxu1 %vm527_vm0, %v1419_v56  ;;  %v1761_v36 = vpop.permute.xlu1 %1760 }
 0x582   : >> { %v3440_v47 = vpop.eup %3439  ;;  %3116 = vmatmul.mubr.msk.f32.gmra.mxu1 %vm527_vm0, %v1420_v7  ;;  %3242 = vmatprep.subr.mxu1 %v3961_v9 }
 0x583   : >> { %v1429_v48 = vmul.f32 %v3440_v47, %v4390_v60  ;;  %v3442_v57 = vpop.eup %3441 }
 0x584   : >> { %v1763_v42 = vpop.permute.xlu0 %1762  ;;  %v3444_v6 = vpop.eup %3443  ;;  %v1430_v38 = vmul.f32 %v3442_v57, %v4384_v53 }
 0x585   : >> { %3150 = vmatprep.subr.mxu0 %v1763_v42  ;;  %3154 = vmatprep.mubr.msk.f32.mxu0 %vm527_vm0, %v1429_v48  ;;  %v1426_v46 = vmul.f32 %v3444_v6, %v4392_v61 }
 0x586   : >> { %v3446_v40 = vpop.eup %3445  ;;  %3151 = vmatpush3.msra.mxu0 %v1763_v42 }
 0x587   : >> { %3152 = vmatprep.subr.mxu0 %v1761_v36  ;;  %v1425_v45 = vmul.f32 %v3446_v40, %v4398_v5  ;;  %v3448_v55 = vpop.eup %3447 }
 0x588   : >> { %3153 = vmatpush3.msra.mxu0 %v1761_v36  ;;  %v1432_v53 = vmul.f32 %v3448_v55, %v4400_v34 }
 0x589   : >> { %3140 = vmatprep.mubr.msk.f32.mxu1 %vm527_vm0, %v1425_v45  ;;  %3155 = vmatmul.mubr.msk.f32.vlgmr.msra.gmra.mxu0 %vm527_vm0, %v1430_v38 }
 0x58a   : >> { %v3450_v60 = vpop.eup %3449  ;;  %3141 = vmatmul.mubr.msk.f32.vlgmr.msra.gmra.mxu1 %vm527_vm0, %v1426_v46  ;;  %3160 = vmatprep.subr.mxu0 %v3961_v9 }
 0x58b   : >> { %v1431_v49 = vmul.f32 %v3450_v60, %v4406_v8  ;;  %3161 = vmatpush3.msra.mxu0 %v3961_v9  ;;  %3243 = vmatpush3.msra.mxu1 %v3961_v9  ;;  %v3452_v61 = vpop.eup %3451 }
 0x58c   : >> { %3168 = vmatprep.subr.mxu0 %v3963_v10  ;;  %3176 = vmatprep.subr.mxu1 %v3965_v11  ;;  %v1428_v8 = vmul.f32 %v3452_v61, %v4408_v4 }
 0x58d   : >> { %3157 = vmatprep.mubr.msk.f32.mxu0 %vm527_vm0, %v1431_v49 }
 0x58e   : >> { %v3454_v5 = vpop.eup %3453  ;;  %3158 = vmatmul.mubr.msk.f32.gmra.mxu0 %vm527_vm0, %v1432_v53 }
 0x58f   : >> { %v1427_v59 = vmul.f32 %v3454_v5, %v4414_v44 }
 0x591   : >> { %3143 = vmatprep.mubr.msk.f32.mxu1 %vm527_vm0, %v1427_v59 }
 0x592   : >> { %3144 = vmatmul.mubr.msk.f32.gmra.mxu1 %vm527_vm0, %v1428_v8 }
 0x636   : >> { %v3128_v50 = vpop.f32.mrf.mxu0 }
 0x638   : >> { %v1632_v41 = vpop.f32.mrf.mxu0 }
 0x63a   : >> { %v3114_v34 = vpop.f32.mrf.mxu1 }
 0x63c   : >> { %v1523_v52 = vpop.f32.mrf.mxu1 }
 0x63d   : >> { %3162 = vmatprep.mubr.msk.f32.mxu0 %vm800_vm3, %v1523_v52 }
 0x63e   : >> { %v3131_v37 = vpop.f32.mrf.mxu0  ;;  %3163 = vmatmul.mubr.msk.f32.vlgmr.msra.gmra.mxu0 %vm800_vm3, %v3114_v34 }
 0x63f   : >> { %3170 = vmatprep.mubr.msk.f32.mxu0 %vm800_vm3, %v1632_v41  ;;  %3169 = vmatpush3.msra.mxu0 %v3963_v10 }
 0x640   : >> { %3184 = vmatprep.subr.mxu0 %v3967_v12  ;;  %v1642_v4 = vpop.f32.mrf.mxu0 }
 0x642   : >> { %v3117_v44 = vpop.f32.mrf.mxu1  ;;  %3171 = vmatmul.mubr.msk.f32.vlgmr.msra.gmra.mxu0 %vm800_vm3, %v3128_v50 }
 0x643   : >> { %3173 = vmatprep.mubr.msk.f32.mxu0 %vm800_vm3, %v1642_v4  ;;  %3185 = vmatpush3.msra.mxu0 %v3967_v12 }
 0x644   : >> { %v1533_v35 = vpop.f32.mrf.mxu1  ;;  %3206 = vmatprep.subr.mxu0 %v3975_v16 }
 0x645   : >> { %3165 = vmatprep.mubr.msk.f32.mxu1 %vm800_vm3, %v1533_v35 }
 0x646   : >> { %3166 = vmatmul.mubr.msk.f32.vlgmr.msra.gmra.mxu1 %vm800_vm3, %v3117_v44  ;;  %3174 = vmatmul.mubr.msk.f32.gmra.mxu0 %vm800_vm3, %v3131_v37 }
 0x647   : >> { %3177 = vmatpush3.msra.mxu1 %v3965_v11 }
 0x649   : >> { %v3156_v63 = vpop.f32.mrf.mxu0 }
 0x64a   : >> { %v3142_v54 = vpop.f32.mrf.mxu1 }
 0x64b   : >> { %v1850_v43 = vpop.f32.mrf.mxu0 }
 0x64c   : >> { %v1741_v33 = vpop.f32.mrf.mxu1  ;;  %3186 = vmatprep.mubr.msk.f32.mxu0 %vm800_vm3, %v1850_v43 }
 0x64d   : >> { %3178 = vmatprep.mubr.msk.f32.mxu1 %vm800_vm3, %v1741_v33  ;;  %3187 = vmatmul.mubr.msk.f32.vlgmr.msra.gmra.mxu0 %vm800_vm3, %v3156_v63 }
 0x64e   : >> { %v3159_v58 = vpop.f32.mrf.mxu0  ;;  %3179 = vmatmul.mubr.msk.f32.vlgmr.msra.gmra.mxu1 %vm800_vm3, %v3142_v54  ;;  %3207 = vmatpush3.msra.mxu0 %v3975_v16 }
 0x64f   : >> { %3208 = vmatprep.subr.mxu0 %v3973_v15 }
 0x650   : >> { %v1860_v51 = vpop.f32.mrf.mxu0  ;;  %3209 = vmatpush3.msra.mxu0 %v3973_v15 }
 0x651   : >> { %3189 = vmatprep.mubr.msk.f32.mxu0 %vm800_vm3, %v1860_v51  ;;  %3210 = vmatprep.subr.mxu0 %v3971_v14 }
 0x652   : >> { %v3145_v39 = vpop.f32.mrf.mxu1  ;;  %3190 = vmatmul.mubr.msk.f32.gmra.mxu0 %vm800_vm3, %v3159_v58 }
 0x653   : >> { %3211 = vmatpush3.msra.mxu0 %v3971_v14 }
 0x654   : >> { %v1751_v56 = vpop.f32.mrf.mxu1  ;;  %3212 = vmatprep.subr.mxu0 %v3969_v13 }
 0x655   : >> { %3181 = vmatprep.mubr.msk.f32.mxu1 %vm800_vm3, %v1751_v56  ;;  %3213 = vmatpush3.msra.mxu0 %v3969_v13 }
 0x656   : >> { %3182 = vmatmul.mubr.msk.f32.gmra.mxu1 %vm800_vm3, %v3145_v39 }
 0x657   : >> { %3200 = vmatprep.mubr.msk.f32.mxu1 %vm527_vm0, %v4020_v25 }
 0x6fe   : >> { %v3164_v62 = vpop.f32.mrf.mxu0 }
 0x6ff   : >> { %v2264_v50 = vsel %vm527_vm0, %v3164_v62, 0.0 }
 0x700   : >> { %v1947_v7 = vpop.f32.mrf.mxu0 }
 0x701   : >> { %v2257_v54 = vsel %vm527_vm0, %v1947_v7, 0.0 }
 0x702   : >> { %v3172_v47 = vpop.f32.mrf.mxu0 }
 0x703   : >> { %v2265_v53 = vsel %vm527_vm0, %v3172_v47, 0.0 }
 0x704   : >> { %v2044_v48 = vpop.f32.mrf.mxu0  ;;  %v2266_v37 = vadd.f32 %v2265_v53, %v2264_v50 }
 0x705   : >> { %v2258_v34 = vsel %vm527_vm0, %v2044_v48, 0.0 }
 0x706   : >> { %v3175_v57 = vpop.f32.mrf.mxu0  ;;  %v3167_v42 = vpop.f32.mrf.mxu1  ;;  %v2259_v51 = vadd.f32 %v2258_v34, %v2257_v54 }
 0x707   : >> { %v2278_v46 = vsel %vm527_vm0, %v3167_v42, 0.0  ;;  %v2279_v55 = vsel %vm527_vm0, %v3175_v57, 0.0 }
 0x708   : >> { %v2054_v6 = vpop.f32.mrf.mxu0  ;;  %v1957_v36 = vpop.f32.mrf.mxu1  ;;  %v2280_v59 = vadd.f32 %v2279_v55, %v2278_v46 }
 0x709   : >> { %v2271_v61 = vsel %vm527_vm0, %v1957_v36, 0.0  ;;  %v2272_v5 = vsel %vm527_vm0, %v2054_v6, 0.0 }
 0x70a   : >> { %v2273_v4 = vadd.f32 %v2272_v5, %v2271_v61 }
 0x70d   : >> { %v3188_v40 = vpop.f32.mrf.mxu0 }
 0x70e   : >> { %v3180_v38 = vpop.f32.mrf.mxu1  ;;  %v2269_v42 = vsel %vm527_vm0, %v3188_v40, 0.0 }
 0x70f   : >> { %v2238_v45 = vpop.f32.mrf.mxu0  ;;  %v2267_v41 = vsel %vm527_vm0, %v3180_v38, 0.0 }
 0x710   : >> { %v2141_v60 = vpop.f32.mrf.mxu1  ;;  %v2268_v39 = vadd.f32 %v2267_v41, %v2266_v37  ;;  %v2262_v7 = vsel %vm527_vm0, %v2238_v45, 0.0 }
 0x711   : >> { %v2260_v43 = vsel %vm527_vm0, %v2141_v60, 0.0 }
 0x712   : >> { %v3191_v49 = vpop.f32.mrf.mxu0  ;;  %v2261_v48 = vadd.f32 %v2260_v43, %v2259_v51  ;;  %v2270_v6 = vadd.f32 %v2269_v42, %v2268_v39 }
 0x713   : >> { %v2283_v33 = vsel %vm527_vm0, %v3191_v49, 0.0 }
 0x714   : >> { %v2248_v44 = vpop.f32.mrf.mxu0  ;;  %v2263_v36 = vadd.f32 %v2262_v7, %v2261_v48 }
 0x715   : >> { %v2276_v47 = vsel %vm527_vm0, %v2248_v44, 0.0 }
 0x716   : >> { %v3183_v8 = vpop.f32.mrf.mxu1 }
 0x717   : >> { %v2281_v52 = vsel %vm527_vm0, %v3183_v8, 0.0 }
 0x718   : >> { %v2282_v35 = vadd.f32 %v2281_v52, %v2280_v59  ;;  %v2151_v63 = vpop.f32.mrf.mxu1 }
 0x719   : >> { %v2274_v58 = vsel %vm527_vm0, %v2151_v63, 0.0 }
 0x71a   : >> { %v2284_v56 = vadd.f32 %v2283_v33, %v2282_v35  ;;  %v2275_v62 = vadd.f32 %v2274_v58, %v2273_v4 }
 0x71c   : >> { %v2277_v57 = vadd.f32 %v2276_v47, %v2275_v62  ;;  %3192 = vmatprep.subr.mxu1 %v2284_v56 }
 0x71d   : >> { %3193 = vmatpush3.msra.mxu1 %v2284_v56 }
 0x71e   : >> { %3194 = vmatprep.subr.mxu1 %v2277_v57 }
 0x71f   : >> { %3195 = vmatpush3.msra.mxu1 %v2277_v57 }
 0x720   : >> { %3196 = vmatprep.subr.mxu1 %v2270_v6 }
 0x721   : >> { %3197 = vmatpush3.msra.mxu1 %v2270_v6 }
 0x722   : >> { %3198 = vmatprep.subr.mxu1 %v2263_v36 }
 0x723   : >> { %3199 = vmatpush3.msra.mxu1 %v2263_v36 }
 0x724   : >> { %3201 = vmatmul.mubr.msk.f32.vlgmr.msra.gmra.mxu1 %vm527_vm0, %v4022_v26  ;;  %3220 = vmatprep.subr.mxu1 %v4018_v24 }
 0x725   : >> { %3203 = vmatprep.mubr.msk.f32.mxu1 %vm527_vm0, %v4024_v27  ;;  %3221 = vmatpush3.msra.mxu1 %v4018_v24 }
 0x726   : >> { %3222 = vmatprep.subr.mxu1 %v4013_v23 }
 0x727   : >> { %3223 = vmatpush3.msra.mxu1 %v4013_v23 }
 0x728   : >> { %3204 = vmatmul.mubr.msk.f32.gmra.mxu1 %vm527_vm0, %v4026_v28  ;;  %3224 = vmatprep.subr.mxu1 %v4008_v22 }
 0x729   : >> { %3225 = vmatpush3.msra.mxu1 %v4008_v22 }
 0x72a   : >> { %3226 = vmatprep.subr.mxu1 %v4003_v21 }
 0x72b   : >> { %3227 = vmatpush3.msra.mxu1 %v4003_v21 }
 0x72c   : >> { %3228 = vmatprep.subr.mxu1 %v3998_v20 }
 0x72d   : >> { %3229 = vmatpush3.msra.mxu1 %v3998_v20 }
 0x72e   : >> { %3230 = vmatprep.subr.mxu1 %v3993_v19 }
 0x72f   : >> { %3231 = vmatpush3.msra.mxu1 %v3993_v19 }
 0x730   : >> { %3232 = vmatprep.subr.mxu1 %v3988_v18 }
 0x731   : >> { %3233 = vmatpush3.msra.mxu1 %v3988_v18 }
 0x732   : >> { %3234 = vmatprep.subr.mxu1 %v3980_v17 }
 0x733   : >> { %3235 = vmatpush3.msra.mxu1 %v3980_v17 }
 0x7e4   : >> { %v3202_v40 = vpop.f32.mrf.mxu1 }
 0x7e5   : >> { %v2383_v38 = vadd.f32 %v3705_v30, %v3202_v40 }
 0x7e6   : >> { %v2363_v45 = vpop.f32.mrf.mxu1 }
 0x7e7   : >> { %v4540_v46 = vadd.f32 %v3935_v2, %v2383_v38  ;;  %v2382_v55 = vadd.f32 %v3709_v29, %v2363_v45 }
 0x7e8   : >> { %v3205_v60 = vpop.f32.mrf.mxu1 }
 0x7e9   : >> { %v4544_v49 = vadd.f32 %v3935_v2, %v2382_v55  ;;  %v2393_v53 = vsel %vm527_vm0, %v4540_v46, 0.0  ;;  %v2385_v5 = vadd.f32 %v3697_v32, %v3205_v60 }
 0x7ea   : >> { %2394 = vadd.xlane.f32.xlu1 %v2393_v53  ;;  %v2373_v61 = vpop.f32.mrf.mxu1 }
 0x7eb   : >> { %v2384_v59 = vadd.f32 %v3701_v31, %v2373_v61  ;;  %v2390_v30 = vsel %vm527_vm0, %v4544_v49, 0.0  ;;  %v4556_v29 = vadd.f32 %v3935_v2, %v2385_v5 }
 0x7ec   : >> { %2391 = vadd.xlane.f32.xlu0 %v2390_v30 }
 0x7ed   : >> { %v4553_v8 = vadd.f32 %v3935_v2, %v2384_v59  ;;  %v2399_v34 = vsel %vm527_vm0, %v4556_v29, 0.0 }
 0x7ef   : >> { %v2396_v50 = vsel %vm527_vm0, %v4553_v8, 0.0 }
 0x7f0   : >> { %2397 = vadd.xlane.f32.xlu0 %v2396_v50 }
 0x7f4   : >> { %2400 = vadd.xlane.f32.xlu0 %v2399_v34 }
 0x873   : >> { %v2395_v32 = vpop.xlane.xlu1 %2394 }
 0x874   : >> { %v2403_v31 = vmul.f32 0.03125, %v2395_v32 }
 0x875   : >> { %v2392_v41 = vpop.xlane.xlu0 %2391 }
 0x876   : >> { %v2407_v52 = vsub.f32 %v4540_v46, %v2403_v31  ;;  %v2402_v37 = vmul.f32 0.03125, %v2392_v41 }
 0x878   : >> { %v2406_v4 = vsub.f32 %v4544_v49, %v2402_v37  ;;  %v2411_v44 = vmul.f32 %v2407_v52, %v2407_v52 }
 0x879   : >> { %v2398_v35 = vpop.xlane.xlu0 %2397 }
 0x87a   : >> { %v2404_v63 = vmul.f32 0.03125, %v2398_v35  ;;  %v2417_v54 = vsel %vm527_vm0, %v2411_v44, 0.0  ;;  %v2410_v43 = vmul.f32 %v2406_v4, %v2406_v4 }
 0x87b   : >> { %2418 = vadd.xlane.f32.xlu1 %v2417_v54 }
 0x87c   : >> { %v2408_v33 = vsub.f32 %v4553_v8, %v2404_v63  ;;  %v2414_v58 = vsel %vm527_vm0, %v2410_v43, 0.0 }
 0x87d   : >> { %2415 = vadd.xlane.f32.xlu0 %v2414_v58  ;;  %v2401_v51 = vpop.xlane.xlu0 %2400 }
 0x87e   : >> { %v2405_v39 = vmul.f32 0.03125, %v2401_v51  ;;  %v2412_v56 = vmul.f32 %v2408_v33, %v2408_v33 }
 0x880   : >> { %v2409_v62 = vsub.f32 %v4556_v29, %v2405_v39  ;;  %v2420_v47 = vsel %vm527_vm0, %v2412_v56, 0.0 }
 0x881   : >> { %2421 = vadd.xlane.f32.xlu0 %v2420_v47 }
 0x882   : >> { %v2413_v48 = vmul.f32 %v2409_v62, %v2409_v62 }
 0x884   : >> { %v2423_v57 = vsel %vm527_vm0, %v2413_v48, 0.0 }
 0x885   : >> { %2424 = vadd.xlane.f32.xlu1 %v2423_v57 }
 0x904   : >> { %v2419_v42 = vpop.xlane.xlu1 %2418 }
 0x905   : >> { %v2427_v6 = vmul.f32 0.03125, %v2419_v42 }
 0x906   : >> { %v2416_v7 = vpop.xlane.xlu0 %2415 }
 0x907   : >> { %v2431_v36 = vadd.f32 1e-05, %v2427_v6  ;;  %v2426_v40 = vmul.f32 0.03125, %v2416_v7 }
 0x909   : >> { %3455 = vrsqrt.f32 %v2431_v36  ;;  %v2430_v38 = vadd.f32 1e-05, %v2426_v40 }
 0x90a   : >> { %v2422_v45 = vpop.xlane.xlu0 %2421 }
 0x90b   : >> { %3457 = vrsqrt.f32 %v2430_v38  ;;  %v2428_v55 = vmul.f32 0.03125, %v2422_v45 }
 0x90d   : >> { %v2432_v60 = vadd.f32 1e-05, %v2428_v55  ;;  %v4713_v55 = vld [vmem:[#allocation22_spill] sm:$0xff] }
 0x90e   : >> { %v2425_v53 = vpop.xlane.xlu1 %2424 }
 0x90f   : >> { %3459 = vrsqrt.f32 %v2432_v60  ;;  %v2429_v61 = vmul.f32 0.03125, %v2425_v53 }
 0x911   : >> { %v2433_v5 = vadd.f32 1e-05, %v2429_v61 }
 0x913   : >> { %3461 = vrsqrt.f32 %v2433_v5 }
 0x916   : >> { %v3456_v59 = vpop.eup %3455 }
 0x917   : >> { %v2439_v30 = vmul.f32 %v3456_v59, %v2407_v52 }
 0x918   : >> { %v3458_v50 = vpop.eup %3457 }
 0x919   : >> { %v2438_v34 = vmul.f32 %v3458_v50, %v2406_v4  ;;  %v2443_v32 = vmul.f32 %v3925_v0, %v2439_v30 }
 0x91b   : >> { %v2442_v31 = vmul.f32 %v3925_v0, %v2438_v34  ;;  %v2447_v35 = vadd.f32 %v3930_v1, %v2443_v32 }
 0x91c   : >> { %v3460_v41 = vpop.eup %3459 }
 0x91d   : >> { %v2446_v37 = vadd.f32 %v3930_v1, %v2442_v31  ;;  %v2440_v44 = vmul.f32 %v3460_v41, %v2408_v33 }
 0x91f   : >> { %3214 = vmatprep.mubr.msk.f32.mxu0 %vm527_vm0, %v2446_v37  ;;  %v2444_v63 = vmul.f32 %v3925_v0, %v2440_v44 }
 0x920   : >> { %v3462_v54 = vpop.eup %3461  ;;  %3215 = vmatmul.mubr.msk.f32.vlgmr.msra.gmra.mxu0 %vm527_vm0, %v2447_v35 }
 0x921   : >> { %v2448_v52 = vadd.f32 %v3930_v1, %v2444_v63  ;;  %v2441_v4 = vmul.f32 %v3462_v54, %v2409_v62 }
 0x923   : >> { %3217 = vmatprep.mubr.msk.f32.mxu0 %vm527_vm0, %v2448_v52  ;;  %v2445_v43 = vmul.f32 %v3925_v0, %v2441_v4 }
 0x925   : >> { %v2449_v58 = vadd.f32 %v3930_v1, %v2445_v43 }
 0x927   : >> { %3218 = vmatmul.mubr.msk.f32.gmra.mxu0 %vm527_vm0, %v2449_v58 }
 0x9e0   : >> { %v3216_v33 = vpop.f32.mrf.mxu0 }
 0x9e1   : >> { %v2534_v51 = vadd.f32 %v3216_v33, %v3937_v3 }
 0x9e2   : >> { %v2528_v39 = vpop.f32.mrf.mxu0 }
 0x9e3   : >> { %v2529_v56 = vadd.f32 %v3937_v3, %v2528_v39 }
 0x9e5   : >> { %3463 = vtanh.f32 %v2529_v56 }
 0x9e6   : >> { %3465 = vtanh.f32 %v2534_v51 }
 0x9e7   : >> { %v3219_v47 = vpop.f32.mrf.mxu0 }
 0x9e8   : >> { %v2544_v48 = vadd.f32 %v3219_v47, %v3937_v3 }
 0x9e9   : >> { %v2538_v62 = vpop.f32.mrf.mxu0 }
 0x9ea   : >> { %v2539_v57 = vadd.f32 %v3937_v3, %v2538_v62 }
 0x9ec   : >> { %3467 = vtanh.f32 %v2539_v57 }
 0x9ed   : >> { %3469 = vtanh.f32 %v2544_v48 }
 0x9f2   : >> { %v3464_v42 = vpop.eup %3463 }
 0x9f3   : >> { %v3466_v6 = vpop.eup %3465  ;;  %3236 = vmatprep.mubr.msk.f32.mxu1 %vm2551_vm4, %v3464_v42 }
 0x9f4   : >> { %3237 = vmatmul.mubr.msk.f32.vlgmr.msra.gmra.mxu1 %vm2551_vm4, %v3466_v6 }
 0x9f9   : >> { %v3468_v7 = vpop.eup %3467 }
 0x9fa   : >> { %v3470_v36 = vpop.eup %3469  ;;  %3239 = vmatprep.mubr.msk.f32.mxu1 %vm2551_vm4, %v3468_v7 }
 0x9fb   : >> { %3240 = vmatmul.mubr.msk.f32.gmra.mxu1 %vm2551_vm4, %v3470_v36 }
 0xab4   : >> { %v3238_v40 = vpop.f32.mrf.mxu1 }
 0xab5   : >> { %v2650_v38 = vadd.f32 %v3238_v40, %v4540_v46 }
 0xab6   : >> { %v2630_v45 = vpop.f32.mrf.mxu1 }
 0xab7   : >> { %v2654_v60 = vadd.f32 %v4713_v55, %v2650_v38   ;;  %v2649_v53 = vadd.f32 %v2630_v45, %v4544_v49 }
 0xab9   : >> { %v2653_v61 = vadd.f32 %v4713_v55, %v2649_v53   ;;  %2659 = vst.msk [vmem:[%s4029_s30 + $0x8] sm:$0xff] (%p519_p7), %vm527_vm0, %v2654_v60 }
 0xabb   : >> { %v3241_v5 = vpop.f32.mrf.mxu1  ;;  %2658 = vst.msk [vmem:[%s4029_s30] sm:$0xff] (%p519_p7), %vm527_vm0, %v2653_v61 }
 0xabc   : >> { %v2652_v59 = vadd.f32 %v3241_v5, %v4556_v29  ;;  %v4717_v29 = vmov %v2653_v61 }
 0xabd   : >> { %v2640_v30 = vpop.f32.mrf.mxu1 }
 0xabe   : >> { %v2656_v50 = vadd.f32 %v4713_v55, %v2652_v59   ;;  %v2651_v34 = vadd.f32 %v2640_v30, %v4553_v8  ;;  %v4716_v30 = vmov %v2654_v60  ;;  %521 = sbr.rel (!%p519_p7) target bundleno = 113 (0x71), region = 127 }
 0xac0   : >> { %v2655_v41 = vadd.f32 %v4713_v55, %v2651_v34   ;;  %v4714_v32 = vmov %v2656_v50  ;;  %2661 = vst.msk [vmem:[%s4029_s30 + $0x18] sm:$0xff] (%p519_p7), %vm527_vm0, %v2656_v50 }
 0xac2   : >> { %v4715_v31 = vmov %v2655_v41  ;;  %2660 = vst.msk [vmem:[%s4029_s30 + $0x10] sm:$0xff] (%p519_p7), %vm527_vm0, %v2655_v41 }
 0xac3   : > { %3614 = shalt.err (!%p3611_p10)
}
 0xac4   : > { %s3615_s29 = scalar_lea.hbm %s4617_s23, 512  ;;  %s3619_s25 = scalar_lea.hbm %s4675_s11, 1024 }
 0xac5   : > { %p3616_p1 = scmp.ne.s32.totalorder %s4617_s23, %s3615_s29  ;;  %p3620_p12 = scmp.lt.s32.totalorder %s4617_s23, %s4675_s11 }
 0xac6   : > { %p3621_p4 = scmp.lt.s32.totalorder %s3619_s25, %s3615_s29 }
 0xac7   : > { %p3617_p2 = pnand %p3616_p1, %p4718_p11 }
 0xac8   : > { %p3622_p7 = por %p3621_p4, %p3620_p12 }
 0xac9   : > { %p3618_p3 = pneg %p3617_p2 }
 0xacb   : > { %p3623_p8 = pnand %p3622_p7, %p3618_p3 }
 0xacd   : > { %3626 = shalt.err (!%p3623_p8)
}
 0xace   : > { %s3728_s24 = smov 128   ;;  %s3729_s19 = smov 8  }
 0xacf   : > { %3264 = dma.vmem_to_hbm [thread:$0]  (%p4718_p11), %s4620_s28, 512, %s4617_s23, %s4624_s15, %s3728_s24, %s3728_s24, %s3729_s19  }
 0xad0 PF: > { %s4719_s14 = sld [smem:[#allocation21_spill]]  ;;  %p3296_p0 = scmp.ge.s32.totalorder %s3693_s20, 2 }
 0xad1   : > { %s2691_s21 = sand.u32 1, %s3681_s17  }
 0xad2   : > { %s2692_s13 = scalar_lea.sflag [#allocation6], %s2691_s21 }
 0xad6   : > { %p4720_p9 = scmp.ne.s32.totalorder %s4719_s14, 0 }
 0xad8   : > { %p3283_p5 = pnand %p3296_p0, %p4720_p9 }
 0xada   : > { %p3284_p6 = pneg %p3283_p5 }
 0xadc   : > { %3676 = dma.done.wait (%p3284_p6), %s2692_s13, 512  }
 0xadd   : > { %3678 = vsyncadd (%p3284_p6), %s2692_s13, 4294966784  ;;  %s4721_s20 = sld [smem:[#allocation19_spill]]  ;;  %s4724_s17 = smov %s3685_s18 }
 0xade   : > { %s4722_s22 = sld [smem:[#allocation18_spill]] }
 0xadf   : > { %s4723_s19 = sld [smem:[#allocation20_spill]] }
 0xae3   : > { %p24_p13 = scmp.ge.s32.totalorder %s4721_s20, 4  }
 0xae4   : > { %s4725_s18 = smov %s4722_s22 }
 0xae5   :  { %26 = sbr.rel (!%p24_p13) target bundleno = 6 (0x6), region = 138 }
 0xaea   :  { %2697 = vsyncpa [#allocation5], 1 }
 0xaeb   :  { %2699 = vsyncpa [#allocation5 + $0x1], 1 }
 0xaec   :  { %2700 = vsyncpa [#allocation8], 1 }
 0xaed   :  { %2701 = vsyncpa [#allocation11], 1 }
 0xaee   :  { %2702 = vsyncpa [#allocation6], 1 }
 0xaef   :  { %2704 = vsyncpa [#allocation6 + $0x1], 1 }

</bundles_post_ra>
